<compile_context>
chip_gen: v5e
topology: v5e:2x2
jax: 0.10.0
libtpu: 0.0.40
codegen_flags: <defaults>
</compile_context>

<pallas_src>
import jax
import jax.numpy as jnp
from jax.experimental import pallas as pl
from jax.experimental.pallas import tpu as pltpu

HEADS = 4
LN_EPS = 1e-5  # torch.nn.LayerNorm default

# order in which preprocessed block params are flattened into kernel args
_BP_ORDER = ("vk", "q_all", "w1", "b1", "w2", "b2", "g0", "be0", "g1", "be1")
_NBP = len(_BP_ORDER)


def _round_up(n, m):
    return ((n + m - 1) // m) * m


def _vmem_capacity_bytes():
    """Best-effort VMEM capacity query; conservative (v7x = 64 MiB) fallback."""
    try:
        info = pltpu.get_tpu_info()
        cap = getattr(info, "vmem_capacity_bytes", None)
        if cap:
            return int(cap)
    except Exception:
        pass
    return 64 * 1024 * 1024


# ----------------------------- shared math helpers ----------------------------
def _layer_norm(z, gamma, beta):
    mu = jnp.mean(z, axis=-1, keepdims=True)
    var = jnp.mean((z - mu) ** 2, axis=-1, keepdims=True)
    return (z - mu) * jax.lax.rsqrt(var + LN_EPS) * gamma + beta


def _split_hi_lo(v):
    """Exact-ish bf16 split: v ≈ hi + lo with |err| ~ 2^-17 * |v|."""
    hi = v.astype(jnp.bfloat16)
    lo = (v - hi.astype(jnp.float32)).astype(jnp.bfloat16)
    return hi, lo


def _mask_contract(mask_bf16, hi, lo):
    """mask @ (hi + lo) as two single-pass bf16 MXU matmuls, f32 accumulate."""
    return (jnp.dot(mask_bf16, hi, preferred_element_type=jnp.float32)
            + jnp.dot(mask_bf16, lo, preferred_element_type=jnp.float32))


def _target_side(numer, denom_h, head_sel, q_all,
                 w1, b1, w2, b2, g0, be0, g1, be1):
    """Finish one AllSetTransformerBlock for a slab of target rows."""
    denom = jnp.dot(denom_h, head_sel, preferred_element_type=jnp.float32)
    # rows with no incident sources have denom == 0 -> message is 0 (+ Q),
    # matching torch.sparse.softmax semantics.
    msg = numer / jnp.where(denom > 0, denom, 1.0) + q_all
    y = _layer_norm(msg, g0, be0)
    h1 = jnp.maximum(
        jnp.dot(y, w1, preferred_element_type=jnp.float32) + b1, 0.0)
    mlp = jnp.dot(h1, w2, preferred_element_type=jnp.float32) + b2
    y = _layer_norm(y + jnp.maximum(mlp, 0.0), g1, be1)
    # sum over number_queries (=1) is a no-op; trailing ReLU is the layer's.
    return jnp.maximum(y, 0.0)
    # TODO(synk): dropout (p=0.2) is identity in eval mode; no RNG here.


def _attention_block(x, mask_bf16, head_sel, params):
    """Whole block (source side + mask contraction + target side), used by the
    single-launch fused kernel on small graphs."""
    vk, q_all, w1, b1, w2, b2, g0, be0, g1, be1 = params
    hidden = q_all.shape[-1]
    # one full-width matmul gives both x@V (all heads) and scores x@(K Q^T)
    xvk = jnp.dot(x, vk, preferred_element_type=jnp.float32)   # [s, hid+H]
    xv = xvk[:, :hidden]
    scores = xvk[:, hidden:]
    # NOTE: global per-head max shift (mathematically equivalent to the
    # per-target masked max; see correctness note in the review).
    e = jnp.exp(scores - jnp.max(scores, axis=0, keepdims=True))   # [s, H]
    sxv = jnp.dot(e, head_sel, preferred_element_type=jnp.float32) * xv
    sxv_hi, sxv_lo = _split_hi_lo(sxv)
    e_hi, e_lo = _split_hi_lo(e)
    numer = _mask_contract(mask_bf16, sxv_hi, sxv_lo)          # [t, hid]
    denom_h = _mask_contract(mask_bf16, e_hi, e_lo)            # [t, H]
    return _target_side(numer, denom_h, head_sel, q_all,
                        w1, b1, w2, b2, g0, be0, g1, be1)


# ------------------------------ Pallas kernels --------------------------------
def _block_tiled_kernel(mask_ref, hi_ref, lo_ref, hs_ref,
                        q_ref, w1_ref, b1_ref, w2_ref, b2_ref,
                        g0_ref, be0_ref, g1_ref, be1_ref, out_ref):
    """One block, gridded over target-row tiles.  The bf16 mask tile is the
    only per-step DMA; the hoisted per-source slabs / weights are resident."""
    hidden = q_ref.shape[-1]
    res = _mask_contract(mask_ref[...], hi_ref[...], lo_ref[...])
    out_ref[...] = _target_side(
        res[:, :hidden], res[:, hidden:], hs_ref[...], q_ref[...],
        w1_ref[...], b1_ref[...], w2_ref[...], b2_ref[...],
        g0_ref[...], be0_ref[...], g1_ref[...], be1_ref[...])


def _fused_layer_kernel(*refs):
    """Whole AllSetTransformerLayer (v2e then e2v) in a single pallas_call."""
    inc_ref, inc_t_ref, x0_ref, hs_ref = refs[:4]
    p_v2e = [r[...] for r in refs[4:4 + _NBP]]
    p_e2v = [r[...] for r in refs[4 + _NBP:4 + 2 * _NBP]]
    x0_out_ref = refs[4 + 2 * _NBP]
    x1_out_ref = refs[4 + 2 * _NBP + 1]

    hs = hs_ref[...]
    x1 = _attention_block(x0_ref[...], inc_t_ref[...], hs, p_v2e)
    x1_out_ref[...] = x1
    x0_out_ref[...] = _attention_block(x1, inc_ref[...], hs, p_e2v)


# ------------------------------ wrappers --------------------------------------
def preprocess_block_params(p):
    """Fold raw per-head params into head-concatenated / pre-contracted form."""
    K, Q, V = p["K"], p["Q"], p["V"]
    heads, c_in, d_h = K.shape
    hidden = heads * d_h
    kq = jnp.einsum("hcd,hd->ch", K, Q[:, 0, :]).astype(jnp.float32)  # [c, H]
    v_all = jnp.transpose(V, (1, 0, 2)).reshape(c_in, hidden)
    vk = jnp.concatenate([v_all, kq], axis=1)                         # [c, hid+H]
    q_all = jnp.transpose(Q, (1, 0, 2)).reshape(1, hidden)
    return dict(vk=vk, q_all=q_all,
                w1=p["w1"], b1=p["b1"], w2=p["w2"], b2=p["b2"],
                g0=p["g0"], be0=p["be0"], g1=p["g1"], be1=p["be1"])


def _source_side_host(x, vk, head_sel, hidden):
    """Tile-invariant per-source slab [sxv | e], computed once (plain XLA),
    returned as exact bf16 hi/lo halves for the in-kernel bf16 contraction."""
    xvk = jnp.dot(x, vk, preferred_element_type=jnp.float32)
    xv = xvk[:, :hidden]
    scores = xvk[:, hidden:]
    e = jnp.exp(scores - jnp.max(scores, axis=0, keepdims=True))
    sxv = jnp.dot(e, head_sel, preferred_element_type=jnp.float32) * xv
    comb = jnp.concatenate([sxv, e], axis=-1)                  # [s, hid+H]
    return _split_hi_lo(comb)


def allset_block_tiled(x_src, mask_bf16, bp, head_sel, *, tile_t=512,
                       vmem_cap=None, vmem_limit=None):
    """One block, target rows tiled over a 1-D 'parallel' grid."""
    n_tgt, n_src = mask_bf16.shape
    hidden = bp["q_all"].shape[-1]
    if vmem_cap is None:
        vmem_cap = _vmem_capacity_bytes()

    # hoisted source-side (runs once, not per grid step)
    src_hi, src_lo = _source_side_host(x_src, bp["vk"], head_sel, hidden)

    # tile choice: as large as possible while the double-buffered bf16 mask
    # stream stays well inside VMEM (generation-aware via vmem_cap).
    tile = max(8, min(_round_up(tile_t, 8), _round_up(n_tgt, 8)))
    mask_budget = max(vmem_cap // 4, 4 * 1024 * 1024)
    while tile > 8 and 2 * tile * n_src * 2 > mask_budget:
        tile = max(8, _round_up(tile // 2, 8))
    n_pad = _round_up(n_tgt, tile)
    mask_p = (mask_bf16 if n_pad == n_tgt
              else jnp.pad(mask_bf16, ((0, n_pad - n_tgt), (0, 0))))

    def full_spec(a):
        shp = a.shape
        return pl.BlockSpec(shp, lambda i, _n=len(shp): (0,) * _n)

    params = [bp[k] for k in _BP_ORDER[1:]]   # q_all, w1, b1, w2, b2, g0..be1
    in_specs = ([pl.BlockSpec((tile, n_src), lambda i: (i, 0)),
                 full_spec(src_hi), full_spec(src_lo), full_spec(head_sel)]
                + [full_spec(a) for a in params])

    out = pl.pallas_call(
        _block_tiled_kernel,
        out_shape=jax.ShapeDtypeStruct((n_pad, hidden), jnp.float32),
        grid=(n_pad // tile,),
        in_specs=in_specs,
        out_specs=pl.BlockSpec((tile, hidden), lambda i: (i, 0)),
        compiler_params=pltpu.CompilerParams(
            dimension_semantics=("parallel",),
            vmem_limit_bytes=vmem_limit),
    )(mask_p, src_hi, src_lo, head_sel, *params)
    return out[:n_tgt] if n_pad != n_tgt else out


def allset_layer_fused(x0, inc_bf16, inc_t_bf16, bp_v2e, bp_e2v, head_sel,
                       *, vmem_limit=None):
    """Whole layer in one launch (small graphs: everything resident in VMEM)."""
    n_nodes, n_edges = inc_bf16.shape
    hidden = bp_v2e["q_all"].shape[-1]
    vmem = pl.BlockSpec(memory_space=pltpu.MemorySpace.VMEM)
    args = ([inc_bf16, inc_t_bf16, x0, head_sel]
            + [bp_v2e[k] for k in _BP_ORDER]
            + [bp_e2v[k] for k in _BP_ORDER])
    x0_out, x1_out = pl.pallas_call(
        _fused_layer_kernel,
        out_shape=(jax.ShapeDtypeStruct((n_nodes, hidden), jnp.float32),
                   jax.ShapeDtypeStruct((n_edges, hidden), jnp.float32)),
        in_specs=[vmem] * len(args),
        out_specs=(vmem, vmem),
        compiler_params=pltpu.CompilerParams(vmem_limit_bytes=vmem_limit),
    )(*args)
    return x0_out, x1_out


def _fused_layer_fits(n_nodes, n_edges, c_in, hidden, heads, vmem_cap):
    """Generation-aware heuristic: can a whole layer live in VMEM at once?"""
    wide = hidden + heads
    inc_b = 2 * n_nodes * n_edges * 2                         # bf16, both orients
    src_b = (n_nodes + n_edges) * (max(c_in, wide) * 4        # x / xvk
                                   + wide * (4 + 2 + 2)       # comb + hi/lo
                                   + 4 * hidden * 4)          # block temps
    w_b = 2 * (max(c_in, hidden) * wide + 2 * hidden * hidden
               + 8 * hidden) * 4
    # conservative quarter-of-VMEM budget leaves room for compiler temps and
    # stays safe on v7x's 64 MiB while still using far more than 6 MiB on
    # 128-MiB parts (v5e/v6e).
    return (inc_b + src_b + w_b) <= vmem_cap // 4


def allset_transformer(x0, incidence, layers_params, *, heads=HEADS,
                       tile_t=512, fuse=None):
    """Forward pass of AllSetTransformer (eval mode)."""
    # binarize (matches `> 0` semantics) and store as bf16 (exact for 0/1)
    inc_bf16 = (incidence > 0).astype(jnp.bfloat16)
    inc_t_bf16 = inc_bf16.T                      # hoisted: transposed once
    hidden = layers_params[0]["v2e"]["w1"].shape[1]
    d_h = hidden // heads
    head_sel = jnp.repeat(jnp.eye(heads, dtype=jnp.float32), d_h, axis=1)

    vmem_cap = _vmem_capacity_bytes()
    vmem_limit = min(int(vmem_cap * 3 // 4), 100 * 1024 * 1024)

    if fuse is None:
        fuse = _fused_layer_fits(incidence.shape[0], incidence.shape[1],
                                 x0.shape[1], hidden, heads, vmem_cap)
    x1 = None
    for lp_raw in layers_params:
        lp_v2e = preprocess_block_params(lp_raw["v2e"])
        lp_e2v = preprocess_block_params(lp_raw["e2v"])
        if fuse:
            x0, x1 = allset_layer_fused(x0, inc_bf16, inc_t_bf16,
                                        lp_v2e, lp_e2v, head_sel,
                                        vmem_limit=vmem_limit)
        else:
            x1 = allset_block_tiled(x0, inc_t_bf16, lp_v2e, head_sel,
                                    tile_t=tile_t, vmem_cap=vmem_cap,
                                    vmem_limit=vmem_limit)
            x0 = allset_block_tiled(x1, inc_bf16, lp_e2v, head_sel,
                                    tile_t=tile_t, vmem_cap=vmem_cap,
                                    vmem_limit=vmem_limit)
    return x0, x1


# ----------------------- plain-JAX reference (for checking) -------------------
def allset_block_ref(x, mask, p):
    heads = p["K"].shape[0]
    neg = jnp.float32(-1e30)
    msgs = []
    for h in range(heads):
        x_k = x @ p["K"][h]
        x_v = x @ p["V"][h]
        score_row = jnp.sum(x_k * p["Q"][h], axis=-1)[None, :]
        masked = jnp.where(mask > 0, score_row, neg)
        row_max = jnp.max(masked, axis=-1, keepdims=True)
        row_max = jnp.where(row_max > 0.5 * neg, row_max, 0.0)
        expv = jnp.where(mask > 0, jnp.exp(masked - row_max), 0.0)
        denom = jnp.sum(expv, axis=-1, keepdims=True)
        attn = expv / jnp.where(denom > 0, denom, 1.0)
        msgs.append(attn @ x_v + p["Q"][h])
    slab = jnp.concatenate(msgs, axis=-1)
    y = _layer_norm(slab, p["g0"], p["be0"])
    h1 = jnp.maximum(y @ p["w1"] + p["b1"], 0.0)
    mlp = h1 @ p["w2"] + p["b2"]
    y = _layer_norm(y + jnp.maximum(mlp, 0.0), p["g1"], p["be1"])
    return jnp.maximum(y, 0.0)


def allset_transformer_ref(x0, incidence, layers_params):
    x1 = None
    for lp in layers_params:
        x1 = allset_block_ref(x0, incidence.T, lp["v2e"])
        x0 = allset_block_ref(x1, incidence, lp["e2v"])
    return x0, x1


# ----------------------- deterministic parameter init -------------------------
def _xavier(key, shape, fan_in, fan_out, gain=1.414):
    lim = gain * (6.0 / (fan_in + fan_out)) ** 0.5
    return jax.random.uniform(key, shape, jnp.float32, -lim, lim)


def init_block_params(key, c_in, hidden, heads):
    d_h = hidden // heads
    ks = jax.random.split(key, 7)
    return dict(
        K=_xavier(ks[0], (heads, c_in, d_h), c_in, d_h),
        Q=_xavier(ks[1], (heads, 1, d_h), 1, d_h),
        V=_xavier(ks[2], (heads, c_in, d_h), c_in, d_h),
        w1=_xavier(ks[3], (hidden, hidden), hidden, hidden, gain=1.0),
        b1=jax.random.uniform(ks[4], (1, hidden), jnp.float32, -0.1, 0.1),
        w2=_xavier(ks[5], (hidden, hidden), hidden, hidden, gain=1.0),
        b2=jax.random.uniform(ks[6], (1, hidden), jnp.float32, -0.1, 0.1),
        g0=jnp.ones((1, hidden), jnp.float32),
        be0=jnp.zeros((1, hidden), jnp.float32),
        g1=jnp.ones((1, hidden), jnp.float32),
        be1=jnp.zeros((1, hidden), jnp.float32),
    )


def _make_incidence(key, n_nodes, n_edges, p=0.35):
    inc = (jax.random.uniform(key, (n_nodes, n_edges)) < p).astype(jnp.float32)
    # guarantee every node belongs to >=1 edge and every edge has >=1 node
    return jnp.maximum(
        inc,
        jax.nn.one_hot(jnp.arange(n_nodes) % n_edges, n_edges,
                       dtype=jnp.float32))


if __name__ == "__main__":
    hidden, heads = 32, HEADS   # n_layers = 1 (module default)

    key = jax.random.PRNGKey(0)
    k_x, k_inc, k_p1, k_p2, k_x2, k_inc2, k_p3, k_p4 = jax.random.split(key, 8)

    # --- test 1: tiny graph -> fused whole-layer kernel path -------------------
    n_nodes, n_edges, in_channels = 12, 6, 8
    x0 = jax.random.normal(k_x, (n_nodes, in_channels), jnp.float32)
    inc = _make_incidence(k_inc, n_nodes, n_edges)
    layer_params = dict(
        v2e=init_block_params(k_p1, in_channels, hidden, heads),
        e2v=init_block_params(k_p2, hidden, hidden, heads),
    )

    x0_out, x1_out = allset_transformer(x0, inc, [layer_params])
    x0_out = jax.block_until_ready(x0_out)
    x1_out = jax.block_until_ready(x1_out)

    r0, r1 = allset_transformer_ref(x0, inc, [layer_params])
    assert x0_out.shape == (n_nodes, hidden) and x1_out.shape == (n_edges, hidden)
    assert jnp.allclose(x1_out, r1, atol=2e-3, rtol=2e-3)
    assert jnp.allclose(x0_out, r0, atol=2e-3, rtol=2e-3)

    # --- test 2: larger graph -> tiled (gridded) per-block kernel path ---------
    n_nodes2, n_edges2, in_channels2 = 40, 24, 16
    x0b = jax.random.normal(k_x2, (n_nodes2, in_channels2), jnp.float32)
    incb = _make_incidence(k_inc2, n_nodes2, n_edges2)
    layer_params_b = dict(
        v2e=init_block_params(k_p3, in_channels2, hidden, heads),
        e2v=init_block_params(k_p4, hidden, hidden, heads),
    )

    # tile_t=16 forces a multi-step grid + row padding (exercises the tiled path)
    xb0_out, xb1_out = allset_transformer(x0b, incb, [layer_params_b],
                                          fuse=False, tile_t=16)
    xb0_out = jax.block_until_ready(xb0_out)
    xb1_out = jax.block_until_ready(xb1_out)

    rb0, rb1 = allset_transformer_ref(x0b, incb, [layer_params_b])
    assert xb0_out.shape == (n_nodes2, hidden) and xb1_out.shape == (n_edges2, hidden)
    assert jnp.allclose(xb1_out, rb1, atol=2e-3, rtol=2e-3)
    assert jnp.allclose(xb0_out, rb0, atol=2e-3, rtol=2e-3)

    print("KERNEL_OK")
</pallas_src>

<mosaic_0001>
module attributes {stable_mosaic.version = 11 : i64} {
  func.func @_fused_layer_kernel(%arg0: memref<12x6xbf16, #tpu.memory_space<vmem>>, %arg1: memref<6x12xbf16, #tpu.memory_space<vmem>>, %arg2: memref<12x8xf32, #tpu.memory_space<vmem>>, %arg3: memref<4x32xf32, #tpu.memory_space<vmem>>, %arg4: memref<8x36xf32, #tpu.memory_space<vmem>>, %arg5: memref<1x32xf32, #tpu.memory_space<vmem>>, %arg6: memref<32x32xf32, #tpu.memory_space<vmem>>, %arg7: memref<1x32xf32, #tpu.memory_space<vmem>>, %arg8: memref<32x32xf32, #tpu.memory_space<vmem>>, %arg9: memref<1x32xf32, #tpu.memory_space<vmem>>, %arg10: memref<1x32xf32, #tpu.memory_space<vmem>>, %arg11: memref<1x32xf32, #tpu.memory_space<vmem>>, %arg12: memref<1x32xf32, #tpu.memory_space<vmem>>, %arg13: memref<1x32xf32, #tpu.memory_space<vmem>>, %arg14: memref<32x36xf32, #tpu.memory_space<vmem>>, %arg15: memref<1x32xf32, #tpu.memory_space<vmem>>, %arg16: memref<32x32xf32, #tpu.memory_space<vmem>>, %arg17: memref<1x32xf32, #tpu.memory_space<vmem>>, %arg18: memref<32x32xf32, #tpu.memory_space<vmem>>, %arg19: memref<1x32xf32, #tpu.memory_space<vmem>>, %arg20: memref<1x32xf32, #tpu.memory_space<vmem>>, %arg21: memref<1x32xf32, #tpu.memory_space<vmem>>, %arg22: memref<1x32xf32, #tpu.memory_space<vmem>>, %arg23: memref<1x32xf32, #tpu.memory_space<vmem>>, %arg24: memref<12x32xf32, #tpu.memory_space<vmem>>, %arg25: memref<6x32xf32, #tpu.memory_space<vmem>>) attributes {dimension_semantics = [], scalar_prefetch = 0 : i64, scratch_operands = 0 : i64, tpu.core_type = #tpu.core_type<tc>} {
    %c0 = arith.constant 0 : index
    %c0_0 = arith.constant 0 : index
    %0 = vector.load %arg4[%c0, %c0_0] : memref<8x36xf32, #tpu.memory_space<vmem>>, vector<8x36xf32>
    %c0_1 = arith.constant 0 : index
    %c0_2 = arith.constant 0 : index
    %1 = vector.load %arg5[%c0_1, %c0_2] : memref<1x32xf32, #tpu.memory_space<vmem>>, vector<1x32xf32>
    %c0_3 = arith.constant 0 : index
    %c0_4 = arith.constant 0 : index
    %2 = vector.load %arg6[%c0_3, %c0_4] : memref<32x32xf32, #tpu.memory_space<vmem>>, vector<32x32xf32>
    %c0_5 = arith.constant 0 : index
    %c0_6 = arith.constant 0 : index
    %3 = vector.load %arg7[%c0_5, %c0_6] : memref<1x32xf32, #tpu.memory_space<vmem>>, vector<1x32xf32>
    %c0_7 = arith.constant 0 : index
    %c0_8 = arith.constant 0 : index
    %4 = vector.load %arg8[%c0_7, %c0_8] : memref<32x32xf32, #tpu.memory_space<vmem>>, vector<32x32xf32>
    %c0_9 = arith.constant 0 : index
    %c0_10 = arith.constant 0 : index
    %5 = vector.load %arg9[%c0_9, %c0_10] : memref<1x32xf32, #tpu.memory_space<vmem>>, vector<1x32xf32>
    %c0_11 = arith.constant 0 : index
    %c0_12 = arith.constant 0 : index
    %6 = vector.load %arg10[%c0_11, %c0_12] : memref<1x32xf32, #tpu.memory_space<vmem>>, vector<1x32xf32>
    %c0_13 = arith.constant 0 : index
    %c0_14 = arith.constant 0 : index
    %7 = vector.load %arg11[%c0_13, %c0_14] : memref<1x32xf32, #tpu.memory_space<vmem>>, vector<1x32xf32>
    %c0_15 = arith.constant 0 : index
    %c0_16 = arith.constant 0 : index
    %8 = vector.load %arg12[%c0_15, %c0_16] : memref<1x32xf32, #tpu.memory_space<vmem>>, vector<1x32xf32>
    %c0_17 = arith.constant 0 : index
    %c0_18 = arith.constant 0 : index
    %9 = vector.load %arg13[%c0_17, %c0_18] : memref<1x32xf32, #tpu.memory_space<vmem>>, vector<1x32xf32>
    %c0_19 = arith.constant 0 : index
    %c0_20 = arith.constant 0 : index
    %10 = vector.load %arg14[%c0_19, %c0_20] : memref<32x36xf32, #tpu.memory_space<vmem>>, vector<32x36xf32>
    %c0_21 = arith.constant 0 : index
    %c0_22 = arith.constant 0 : index
    %11 = vector.load %arg15[%c0_21, %c0_22] : memref<1x32xf32, #tpu.memory_space<vmem>>, vector<1x32xf32>
    %c0_23 = arith.constant 0 : index
    %c0_24 = arith.constant 0 : index
    %12 = vector.load %arg16[%c0_23, %c0_24] : memref<32x32xf32, #tpu.memory_space<vmem>>, vector<32x32xf32>
    %c0_25 = arith.constant 0 : index
    %c0_26 = arith.constant 0 : index
    %13 = vector.load %arg17[%c0_25, %c0_26] : memref<1x32xf32, #tpu.memory_space<vmem>>, vector<1x32xf32>
    %c0_27 = arith.constant 0 : index
    %c0_28 = arith.constant 0 : index
    %14 = vector.load %arg18[%c0_27, %c0_28] : memref<32x32xf32, #tpu.memory_space<vmem>>, vector<32x32xf32>
    %c0_29 = arith.constant 0 : index
    %c0_30 = arith.constant 0 : index
    %15 = vector.load %arg19[%c0_29, %c0_30] : memref<1x32xf32, #tpu.memory_space<vmem>>, vector<1x32xf32>
    %c0_31 = arith.constant 0 : index
    %c0_32 = arith.constant 0 : index
    %16 = vector.load %arg20[%c0_31, %c0_32] : memref<1x32xf32, #tpu.memory_space<vmem>>, vector<1x32xf32>
    %c0_33 = arith.constant 0 : index
    %c0_34 = arith.constant 0 : index
    %17 = vector.load %arg21[%c0_33, %c0_34] : memref<1x32xf32, #tpu.memory_space<vmem>>, vector<1x32xf32>
    %c0_35 = arith.constant 0 : index
    %c0_36 = arith.constant 0 : index
    %18 = vector.load %arg22[%c0_35, %c0_36] : memref<1x32xf32, #tpu.memory_space<vmem>>, vector<1x32xf32>
    %c0_37 = arith.constant 0 : index
    %c0_38 = arith.constant 0 : index
    %19 = vector.load %arg23[%c0_37, %c0_38] : memref<1x32xf32, #tpu.memory_space<vmem>>, vector<1x32xf32>
    %c0_39 = arith.constant 0 : index
    %c0_40 = arith.constant 0 : index
    %20 = vector.load %arg3[%c0_39, %c0_40] : memref<4x32xf32, #tpu.memory_space<vmem>>, vector<4x32xf32>
    %c0_41 = arith.constant 0 : index
    %c0_42 = arith.constant 0 : index
    %21 = vector.load %arg2[%c0_41, %c0_42] : memref<12x8xf32, #tpu.memory_space<vmem>>, vector<12x8xf32>
    %c0_43 = arith.constant 0 : index
    %c0_44 = arith.constant 0 : index
    %22 = vector.load %arg1[%c0_43, %c0_44] : memref<6x12xbf16, #tpu.memory_space<vmem>>, vector<6x12xbf16>
    %cst = arith.constant dense<0.000000e+00> : vector<12x36xf32>
    %23 = tpu.matmul %21, %0, %cst {dimension_numbers = #tpu.dot_dimension_numbers<[1], [0], [0], [1], [0, 0, 1, 1], [], []>} : vector<12x8xf32>, vector<8x36xf32>, vector<12x36xf32> -> vector<12x36xf32>
    %24 = vector.extract_strided_slice %23 {offsets = [0, 0], sizes = [12, 32], strides = [1, 1]} : vector<12x36xf32> to vector<12x32xf32>
    %25 = vector.extract_strided_slice %23 {offsets = [0, 32], sizes = [12, 4], strides = [1, 1]} : vector<12x36xf32> to vector<12x4xf32>
    %cst_45 = arith.constant dense<0xFF800000> : vector<4xf32>
    %26 = vector.multi_reduction <maximumf>, %25, %cst_45 [0] : vector<12x4xf32> to vector<4xf32>
    %27 = vector.shape_cast %26 : vector<4xf32> to vector<1x4xf32>
    %28 = vector.broadcast %27 : vector<1x4xf32> to vector<12x4xf32>
    %29 = arith.subf %25, %28 : vector<12x4xf32>
    %30 = math.exp %29 : vector<12x4xf32>
    %cst_46 = arith.constant dense<0.000000e+00> : vector<12x32xf32>
    %31 = tpu.matmul %30, %20, %cst_46 {dimension_numbers = #tpu.dot_dimension_numbers<[1], [0], [0], [1], [0, 0, 1, 1], [], []>} : vector<12x4xf32>, vector<4x32xf32>, vector<12x32xf32> -> vector<12x32xf32>
    %32 = arith.mulf %31, %24 : vector<12x32xf32>
    %33 = arith.truncf %32 : vector<12x32xf32> to vector<12x32xbf16>
    %34 = arith.extf %33 : vector<12x32xbf16> to vector<12x32xf32>
    %35 = arith.subf %32, %34 : vector<12x32xf32>
    %36 = arith.truncf %35 : vector<12x32xf32> to vector<12x32xbf16>
    %37 = arith.truncf %30 : vector<12x4xf32> to vector<12x4xbf16>
    %38 = arith.extf %37 : vector<12x4xbf16> to vector<12x4xf32>
    %39 = arith.subf %30, %38 : vector<12x4xf32>
    %40 = arith.truncf %39 : vector<12x4xf32> to vector<12x4xbf16>
    %cst_47 = arith.constant dense<0.000000e+00> : vector<6x32xf32>
    %41 = tpu.matmul %22, %33, %cst_47 {dimension_numbers = #tpu.dot_dimension_numbers<[1], [0], [0], [1], [0, 0, 1, 1], [], []>} : vector<6x12xbf16>, vector<12x32xbf16>, vector<6x32xf32> -> vector<6x32xf32>
    %cst_48 = arith.constant dense<0.000000e+00> : vector<6x32xf32>
    %42 = tpu.matmul %22, %36, %cst_48 {dimension_numbers = #tpu.dot_dimension_numbers<[1], [0], [0], [1], [0, 0, 1, 1], [], []>} : vector<6x12xbf16>, vector<12x32xbf16>, vector<6x32xf32> -> vector<6x32xf32>
    %43 = arith.addf %41, %42 : vector<6x32xf32>
    %cst_49 = arith.constant dense<0.000000e+00> : vector<6x4xf32>
    %44 = tpu.matmul %22, %37, %cst_49 {dimension_numbers = #tpu.dot_dimension_numbers<[1], [0], [0], [1], [0, 0, 1, 1], [], []>} : vector<6x12xbf16>, vector<12x4xbf16>, vector<6x4xf32> -> vector<6x4xf32>
    %cst_50 = arith.constant dense<0.000000e+00> : vector<6x4xf32>
    %45 = tpu.matmul %22, %40, %cst_50 {dimension_numbers = #tpu.dot_dimension_numbers<[1], [0], [0], [1], [0, 0, 1, 1], [], []>} : vector<6x12xbf16>, vector<12x4xbf16>, vector<6x4xf32> -> vector<6x4xf32>
    %46 = arith.addf %44, %45 : vector<6x4xf32>
    %cst_51 = arith.constant dense<0.000000e+00> : vector<6x32xf32>
    %47 = tpu.matmul %46, %20, %cst_51 {dimension_numbers = #tpu.dot_dimension_numbers<[1], [0], [0], [1], [0, 0, 1, 1], [], []>} : vector<6x4xf32>, vector<4x32xf32>, vector<6x32xf32> -> vector<6x32xf32>
    %cst_52 = arith.constant 0.000000e+00 : f32
    %48 = vector.broadcast %cst_52 : f32 to vector<6x32xf32>
    %49 = arith.cmpf ogt, %47, %48 : vector<6x32xf32>
    %cst_53 = arith.constant 1.000000e+00 : f32
    %50 = vector.broadcast %cst_53 : f32 to vector<6x32xf32>
    %51 = arith.select %49, %47, %50 : vector<6x32xi1>, vector<6x32xf32>
    %52 = arith.divf %43, %51 : vector<6x32xf32>
    %53 = vector.broadcast %1 : vector<1x32xf32> to vector<6x32xf32>
    %54 = arith.addf %52, %53 : vector<6x32xf32>
    %cst_54 = arith.constant dense<0.000000e+00> : vector<6xf32>
    %55 = vector.multi_reduction <add>, %54, %cst_54 [1] : vector<6x32xf32> to vector<6xf32>
    %56 = vector.shape_cast %55 : vector<6xf32> to vector<6x1xf32>
    %cst_55 = arith.constant 3.200000e+01 : f32
    %57 = vector.broadcast %cst_55 : f32 to vector<6x1xf32>
    %58 = arith.divf %56, %57 : vector<6x1xf32>
    %59 = vector.broadcast %58 : vector<6x1xf32> to vector<6x32xf32>
    %60 = arith.subf %54, %59 : vector<6x32xf32>
    %61 = arith.mulf %60, %60 : vector<6x32xf32>
    %cst_56 = arith.constant dense<0.000000e+00> : vector<6xf32>
    %62 = vector.multi_reduction <add>, %61, %cst_56 [1] : vector<6x32xf32> to vector<6xf32>
    %63 = vector.shape_cast %62 : vector<6xf32> to vector<6x1xf32>
    %cst_57 = arith.constant 3.200000e+01 : f32
    %64 = vector.broadcast %cst_57 : f32 to vector<6x1xf32>
    %65 = arith.divf %63, %64 : vector<6x1xf32>
    %66 = vector.broadcast %58 : vector<6x1xf32> to vector<6x32xf32>
    %67 = arith.subf %54, %66 : vector<6x32xf32>
    %cst_58 = arith.constant 9.99999974E-6 : f32
    %68 = vector.broadcast %cst_58 : f32 to vector<6x1xf32>
    %69 = arith.addf %65, %68 : vector<6x1xf32>
    %70 = math.rsqrt %69 : vector<6x1xf32>
    %71 = vector.broadcast %70 : vector<6x1xf32> to vector<6x32xf32>
    %72 = arith.mulf %67, %71 : vector<6x32xf32>
    %73 = vector.broadcast %6 : vector<1x32xf32> to vector<6x32xf32>
    %74 = arith.mulf %72, %73 : vector<6x32xf32>
    %75 = vector.broadcast %7 : vector<1x32xf32> to vector<6x32xf32>
    %76 = arith.addf %74, %75 : vector<6x32xf32>
    %cst_59 = arith.constant dense<0.000000e+00> : vector<6x32xf32>
    %77 = tpu.matmul %76, %2, %cst_59 {dimension_numbers = #tpu.dot_dimension_numbers<[1], [0], [0], [1], [0, 0, 1, 1], [], []>} : vector<6x32xf32>, vector<32x32xf32>, vector<6x32xf32> -> vector<6x32xf32>
    %78 = vector.broadcast %3 : vector<1x32xf32> to vector<6x32xf32>
    %79 = arith.addf %77, %78 : vector<6x32xf32>
    %cst_60 = arith.constant 0.000000e+00 : f32
    %80 = vector.broadcast %cst_60 : f32 to vector<6x32xf32>
    %81 = arith.maximumf %79, %80 : vector<6x32xf32>
    %cst_61 = arith.constant dense<0.000000e+00> : vector<6x32xf32>
    %82 = tpu.matmul %81, %4, %cst_61 {dimension_numbers = #tpu.dot_dimension_numbers<[1], [0], [0], [1], [0, 0, 1, 1], [], []>} : vector<6x32xf32>, vector<32x32xf32>, vector<6x32xf32> -> vector<6x32xf32>
    %83 = vector.broadcast %5 : vector<1x32xf32> to vector<6x32xf32>
    %84 = arith.addf %82, %83 : vector<6x32xf32>
    %cst_62 = arith.constant 0.000000e+00 : f32
    %85 = vector.broadcast %cst_62 : f32 to vector<6x32xf32>
    %86 = arith.maximumf %84, %85 : vector<6x32xf32>
    %87 = arith.addf %76, %86 : vector<6x32xf32>
    %cst_63 = arith.constant dense<0.000000e+00> : vector<6xf32>
    %88 = vector.multi_reduction <add>, %87, %cst_63 [1] : vector<6x32xf32> to vector<6xf32>
    %89 = vector.shape_cast %88 : vector<6xf32> to vector<6x1xf32>
    %cst_64 = arith.constant 3.200000e+01 : f32
    %90 = vector.broadcast %cst_64 : f32 to vector<6x1xf32>
    %91 = arith.divf %89, %90 : vector<6x1xf32>
    %92 = vector.broadcast %91 : vector<6x1xf32> to vector<6x32xf32>
    %93 = arith.subf %87, %92 : vector<6x32xf32>
    %94 = arith.mulf %93, %93 : vector<6x32xf32>
    %cst_65 = arith.constant dense<0.000000e+00> : vector<6xf32>
    %95 = vector.multi_reduction <add>, %94, %cst_65 [1] : vector<6x32xf32> to vector<6xf32>
    %96 = vector.shape_cast %95 : vector<6xf32> to vector<6x1xf32>
    %cst_66 = arith.constant 3.200000e+01 : f32
    %97 = vector.broadcast %cst_66 : f32 to vector<6x1xf32>
    %98 = arith.divf %96, %97 : vector<6x1xf32>
    %99 = vector.broadcast %91 : vector<6x1xf32> to vector<6x32xf32>
    %100 = arith.subf %87, %99 : vector<6x32xf32>
    %cst_67 = arith.constant 9.99999974E-6 : f32
    %101 = vector.broadcast %cst_67 : f32 to vector<6x1xf32>
    %102 = arith.addf %98, %101 : vector<6x1xf32>
    %103 = math.rsqrt %102 : vector<6x1xf32>
    %104 = vector.broadcast %103 : vector<6x1xf32> to vector<6x32xf32>
    %105 = arith.mulf %100, %104 : vector<6x32xf32>
    %106 = vector.broadcast %8 : vector<1x32xf32> to vector<6x32xf32>
    %107 = arith.mulf %105, %106 : vector<6x32xf32>
    %108 = vector.broadcast %9 : vector<1x32xf32> to vector<6x32xf32>
    %109 = arith.addf %107, %108 : vector<6x32xf32>
    %cst_68 = arith.constant 0.000000e+00 : f32
    %110 = vector.broadcast %cst_68 : f32 to vector<6x32xf32>
    %111 = arith.maximumf %109, %110 : vector<6x32xf32>
    %c0_69 = arith.constant 0 : index
    %c0_70 = arith.constant 0 : index
    %112 = vector.load %arg25[%c0_69, %c0_70] : memref<6x32xf32, #tpu.memory_space<vmem>>, vector<6x32xf32>
    tpu.vector_store %arg25[%c0_69, %c0_70], %111 {strides = array<i32>} : memref<6x32xf32, #tpu.memory_space<vmem>>, vector<6x32xf32>,
    %c0_71 = arith.constant 0 : index
    %c0_72 = arith.constant 0 : index
    %113 = vector.load %arg0[%c0_71, %c0_72] : memref<12x6xbf16, #tpu.memory_space<vmem>>, vector<12x6xbf16>
    %cst_73 = arith.constant dense<0.000000e+00> : vector<6x36xf32>
    %114 = tpu.matmul %111, %10, %cst_73 {dimension_numbers = #tpu.dot_dimension_numbers<[1], [0], [0], [1], [0, 0, 1, 1], [], []>} : vector<6x32xf32>, vector<32x36xf32>, vector<6x36xf32> -> vector<6x36xf32>
    %115 = vector.extract_strided_slice %114 {offsets = [0, 0], sizes = [6, 32], strides = [1, 1]} : vector<6x36xf32> to vector<6x32xf32>
    %116 = vector.extract_strided_slice %114 {offsets = [0, 32], sizes = [6, 4], strides = [1, 1]} : vector<6x36xf32> to vector<6x4xf32>
    %cst_74 = arith.constant dense<0xFF800000> : vector<4xf32>
    %117 = vector.multi_reduction <maximumf>, %116, %cst_74 [0] : vector<6x4xf32> to vector<4xf32>
    %118 = vector.shape_cast %117 : vector<4xf32> to vector<1x4xf32>
    %119 = vector.broadcast %118 : vector<1x4xf32> to vector<6x4xf32>
    %120 = arith.subf %116, %119 : vector<6x4xf32>
    %121 = math.exp %120 : vector<6x4xf32>
    %cst_75 = arith.constant dense<0.000000e+00> : vector<6x32xf32>
    %122 = tpu.matmul %121, %20, %cst_75 {dimension_numbers = #tpu.dot_dimension_numbers<[1], [0], [0], [1], [0, 0, 1, 1], [], []>} : vector<6x4xf32>, vector<4x32xf32>, vector<6x32xf32> -> vector<6x32xf32>
    %123 = arith.mulf %122, %115 : vector<6x32xf32>
    %124 = arith.truncf %123 : vector<6x32xf32> to vector<6x32xbf16>
    %125 = arith.extf %124 : vector<6x32xbf16> to vector<6x32xf32>
    %126 = arith.subf %123, %125 : vector<6x32xf32>
    %127 = arith.truncf %126 : vector<6x32xf32> to vector<6x32xbf16>
    %128 = arith.truncf %121 : vector<6x4xf32> to vector<6x4xbf16>
    %129 = arith.extf %128 : vector<6x4xbf16> to vector<6x4xf32>
    %130 = arith.subf %121, %129 : vector<6x4xf32>
    %131 = arith.truncf %130 : vector<6x4xf32> to vector<6x4xbf16>
    %cst_76 = arith.constant dense<0.000000e+00> : vector<12x32xf32>
    %132 = tpu.matmul %113, %124, %cst_76 {dimension_numbers = #tpu.dot_dimension_numbers<[1], [0], [0], [1], [0, 0, 1, 1], [], []>} : vector<12x6xbf16>, vector<6x32xbf16>, vector<12x32xf32> -> vector<12x32xf32>
    %cst_77 = arith.constant dense<0.000000e+00> : vector<12x32xf32>
    %133 = tpu.matmul %113, %127, %cst_77 {dimension_numbers = #tpu.dot_dimension_numbers<[1], [0], [0], [1], [0, 0, 1, 1], [], []>} : vector<12x6xbf16>, vector<6x32xbf16>, vector<12x32xf32> -> vector<12x32xf32>
    %134 = arith.addf %132, %133 : vector<12x32xf32>
    %cst_78 = arith.constant dense<0.000000e+00> : vector<12x4xf32>
    %135 = tpu.matmul %113, %128, %cst_78 {dimension_numbers = #tpu.dot_dimension_numbers<[1], [0], [0], [1], [0, 0, 1, 1], [], []>} : vector<12x6xbf16>, vector<6x4xbf16>, vector<12x4xf32> -> vector<12x4xf32>
    %cst_79 = arith.constant dense<0.000000e+00> : vector<12x4xf32>
    %136 = tpu.matmul %113, %131, %cst_79 {dimension_numbers = #tpu.dot_dimension_numbers<[1], [0], [0], [1], [0, 0, 1, 1], [], []>} : vector<12x6xbf16>, vector<6x4xbf16>, vector<12x4xf32> -> vector<12x4xf32>
    %137 = arith.addf %135, %136 : vector<12x4xf32>
    %cst_80 = arith.constant dense<0.000000e+00> : vector<12x32xf32>
    %138 = tpu.matmul %137, %20, %cst_80 {dimension_numbers = #tpu.dot_dimension_numbers<[1], [0], [0], [1], [0, 0, 1, 1], [], []>} : vector<12x4xf32>, vector<4x32xf32>, vector<12x32xf32> -> vector<12x32xf32>
    %cst_81 = arith.constant 0.000000e+00 : f32
    %139 = vector.broadcast %cst_81 : f32 to vector<12x32xf32>
    %140 = arith.cmpf ogt, %138, %139 : vector<12x32xf32>
    %cst_82 = arith.constant 1.000000e+00 : f32
    %141 = vector.broadcast %cst_82 : f32 to vector<12x32xf32>
    %142 = arith.select %140, %138, %141 : vector<12x32xi1>, vector<12x32xf32>
    %143 = arith.divf %134, %142 : vector<12x32xf32>
    %144 = vector.broadcast %11 : vector<1x32xf32> to vector<12x32xf32>
    %145 = arith.addf %143, %144 : vector<12x32xf32>
    %cst_83 = arith.constant dense<0.000000e+00> : vector<12xf32>
    %146 = vector.multi_reduction <add>, %145, %cst_83 [1] : vector<12x32xf32> to vector<12xf32>
    %147 = vector.shape_cast %146 : vector<12xf32> to vector<12x1xf32>
    %cst_84 = arith.constant 3.200000e+01 : f32
    %148 = vector.broadcast %cst_84 : f32 to vector<12x1xf32>
    %149 = arith.divf %147, %148 : vector<12x1xf32>
    %150 = vector.broadcast %149 : vector<12x1xf32> to vector<12x32xf32>
    %151 = arith.subf %145, %150 : vector<12x32xf32>
    %152 = arith.mulf %151, %151 : vector<12x32xf32>
    %cst_85 = arith.constant dense<0.000000e+00> : vector<12xf32>
    %153 = vector.multi_reduction <add>, %152, %cst_85 [1] : vector<12x32xf32> to vector<12xf32>
    %154 = vector.shape_cast %153 : vector<12xf32> to vector<12x1xf32>
    %cst_86 = arith.constant 3.200000e+01 : f32
    %155 = vector.broadcast %cst_86 : f32 to vector<12x1xf32>
    %156 = arith.divf %154, %155 : vector<12x1xf32>
    %157 = vector.broadcast %149 : vector<12x1xf32> to vector<12x32xf32>
    %158 = arith.subf %145, %157 : vector<12x32xf32>
    %cst_87 = arith.constant 9.99999974E-6 : f32
    %159 = vector.broadcast %cst_87 : f32 to vector<12x1xf32>
    %160 = arith.addf %156, %159 : vector<12x1xf32>
    %161 = math.rsqrt %160 : vector<12x1xf32>
    %162 = vector.broadcast %161 : vector<12x1xf32> to vector<12x32xf32>
    %163 = arith.mulf %158, %162 : vector<12x32xf32>
    %164 = vector.broadcast %16 : vector<1x32xf32> to vector<12x32xf32>
    %165 = arith.mulf %163, %164 : vector<12x32xf32>
    %166 = vector.broadcast %17 : vector<1x32xf32> to vector<12x32xf32>
    %167 = arith.addf %165, %166 : vector<12x32xf32>
    %cst_88 = arith.constant dense<0.000000e+00> : vector<12x32xf32>
    %168 = tpu.matmul %167, %12, %cst_88 {dimension_numbers = #tpu.dot_dimension_numbers<[1], [0], [0], [1], [0, 0, 1, 1], [], []>} : vector<12x32xf32>, vector<32x32xf32>, vector<12x32xf32> -> vector<12x32xf32>
    %169 = vector.broadcast %13 : vector<1x32xf32> to vector<12x32xf32>
    %170 = arith.addf %168, %169 : vector<12x32xf32>
    %cst_89 = arith.constant 0.000000e+00 : f32
    %171 = vector.broadcast %cst_89 : f32 to vector<12x32xf32>
    %172 = arith.maximumf %170, %171 : vector<12x32xf32>
    %cst_90 = arith.constant dense<0.000000e+00> : vector<12x32xf32>
    %173 = tpu.matmul %172, %14, %cst_90 {dimension_numbers = #tpu.dot_dimension_numbers<[1], [0], [0], [1], [0, 0, 1, 1], [], []>} : vector<12x32xf32>, vector<32x32xf32>, vector<12x32xf32> -> vector<12x32xf32>
    %174 = vector.broadcast %15 : vector<1x32xf32> to vector<12x32xf32>
    %175 = arith.addf %173, %174 : vector<12x32xf32>
    %cst_91 = arith.constant 0.000000e+00 : f32
    %176 = vector.broadcast %cst_91 : f32 to vector<12x32xf32>
    %177 = arith.maximumf %175, %176 : vector<12x32xf32>
    %178 = arith.addf %167, %177 : vector<12x32xf32>
    %cst_92 = arith.constant dense<0.000000e+00> : vector<12xf32>
    %179 = vector.multi_reduction <add>, %178, %cst_92 [1] : vector<12x32xf32> to vector<12xf32>
    %180 = vector.shape_cast %179 : vector<12xf32> to vector<12x1xf32>
    %cst_93 = arith.constant 3.200000e+01 : f32
    %181 = vector.broadcast %cst_93 : f32 to vector<12x1xf32>
    %182 = arith.divf %180, %181 : vector<12x1xf32>
    %183 = vector.broadcast %182 : vector<12x1xf32> to vector<12x32xf32>
    %184 = arith.subf %178, %183 : vector<12x32xf32>
    %185 = arith.mulf %184, %184 : vector<12x32xf32>
    %cst_94 = arith.constant dense<0.000000e+00> : vector<12xf32>
    %186 = vector.multi_reduction <add>, %185, %cst_94 [1] : vector<12x32xf32> to vector<12xf32>
    %187 = vector.shape_cast %186 : vector<12xf32> to vector<12x1xf32>
    %cst_95 = arith.constant 3.200000e+01 : f32
    %188 = vector.broadcast %cst_95 : f32 to vector<12x1xf32>
    %189 = arith.divf %187, %188 : vector<12x1xf32>
    %190 = vector.broadcast %182 : vector<12x1xf32> to vector<12x32xf32>
    %191 = arith.subf %178, %190 : vector<12x32xf32>
    %cst_96 = arith.constant 9.99999974E-6 : f32
    %192 = vector.broadcast %cst_96 : f32 to vector<12x1xf32>
    %193 = arith.addf %189, %192 : vector<12x1xf32>
    %194 = math.rsqrt %193 : vector<12x1xf32>
    %195 = vector.broadcast %194 : vector<12x1xf32> to vector<12x32xf32>
    %196 = arith.mulf %191, %195 : vector<12x32xf32>
    %197 = vector.broadcast %18 : vector<1x32xf32> to vector<12x32xf32>
    %198 = arith.mulf %196, %197 : vector<12x32xf32>
    %199 = vector.broadcast %19 : vector<1x32xf32> to vector<12x32xf32>
    %200 = arith.addf %198, %199 : vector<12x32xf32>
    %cst_97 = arith.constant 0.000000e+00 : f32
    %201 = vector.broadcast %cst_97 : f32 to vector<12x32xf32>
    %202 = arith.maximumf %200, %201 : vector<12x32xf32>
    %c0_98 = arith.constant 0 : index
    %c0_99 = arith.constant 0 : index
    %203 = vector.load %arg24[%c0_98, %c0_99] : memref<12x32xf32, #tpu.memory_space<vmem>>, vector<12x32xf32>
    tpu.vector_store %arg24[%c0_98, %c0_99], %202 {strides = array<i32>} : memref<12x32xf32, #tpu.memory_space<vmem>>, vector<12x32xf32>,
    return
  }
}

</mosaic_0001>

<bundles_post_ra>
// kernel: tpu_custom_call.1
= control target key start
LH: loop header
LB: loop body
LE: loop exit
PB: predicated region body
PF: predicated region fallthrough
CT: control target
= control target key end

     0   :  { %s1577_s0 = inlined_call_operand.vmem [shape: bf16[12,6], index: 0, kind: input, shape index: {}]   ;;  %s1578_s1 = inlined_call_operand.vmem [shape: bf16[6,12], index: 1, kind: input, shape index: {}]   ;;  %s1579_s2 = inlined_call_operand.vmem [shape: f32[12,8], index: 2, kind: input, shape index: {}]   ;;  %s1580_s3 = inlined_call_operand.vmem [shape: f32[4,32], index: 3, kind: input, shape index: {}]   ;;  %s1581_s4 = inlined_call_operand.vmem [shape: f32[8,36], index: 4, kind: input, shape index: {}]   ;;  %s1582_s5 = inlined_call_operand.vmem [shape: f32[1,32], index: 5, kind: input, shape index: {}]   ;;  %s1583_s6 = inlined_call_operand.hbm [shape: f32[32,32], index: 6, kind: input, shape index: {}]   ;;  %s1584_s7 = inlined_call_operand.vmem [shape: f32[1,32], index: 7, kind: input, shape index: {}]   ;;  %s1585_s8 = inlined_call_operand.hbm [shape: f32[32,32], index: 8, kind: input, shape index: {}]   ;;  %s1586_s9 = inlined_call_operand.vmem [shape: f32[1,32], index: 9, kind: input, shape index: {}]   ;;  %s1587_s10 = inlined_call_operand.vmem [shape: f32[1,32], index: 10, kind: input, shape index: {}]   ;;  %s1588_s11 = inlined_call_operand.vmem [shape: f32[1,32], index: 11, kind: input, shape index: {}]   ;;  %s1589_s12 = inlined_call_operand.vmem [shape: f32[1,32], index: 12, kind: input, shape index: {}]   ;;  %s1590_s13 = inlined_call_operand.vmem [shape: f32[1,32], index: 13, kind: input, shape index: {}]   ;;  %s1591_s14 = inlined_call_operand.hbm [shape: f32[32,36], index: 14, kind: input, shape index: {}]   ;;  %s1592_s15 = inlined_call_operand.vmem [shape: f32[1,32], index: 15, kind: input, shape index: {}]   ;;  %s1593_s16 = inlined_call_operand.hbm [shape: f32[32,32], index: 16, kind: input, shape index: {}]   ;;  %s1594_s17 = inlined_call_operand.vmem [shape: f32[1,32], index: 17, kind: input, shape index: {}]   ;;  %s1595_s18 = inlined_call_operand.hbm [shape: f32[32,32], index: 18, kind: input, shape index: {}]   ;;  %s1596_s19 = inlined_call_operand.vmem [shape: f32[1,32], index: 19, kind: input, shape index: {}]   ;;  %s1597_s20 = inlined_call_operand.vmem [shape: f32[1,32], index: 20, kind: input, shape index: {}]   ;;  %s1598_s21 = inlined_call_operand.vmem [shape: f32[1,32], index: 21, kind: input, shape index: {}]   ;;  %s1599_s22 = inlined_call_operand.vmem [shape: f32[1,32], index: 22, kind: input, shape index: {}]   ;;  %s1600_s23 = inlined_call_operand.vmem [shape: f32[1,32], index: 23, kind: input, shape index: {}]   ;;  %s1601_s24 = inlined_call_operand.hbm [shape: f32[12,32], index: 24, kind: output, shape index: {0}]   ;;  %s1602_s25 = inlined_call_operand.hbm [shape: f32[6,32], index: 25, kind: output, shape index: {1}]  }
   0x1   :  { %1605 = sst [smem:[#allocation19_spill]] %s1577_s0 }
   0x2   :  { %1606 = sst [smem:[#allocation20_spill]] %s1578_s1 }
   0x3   :  { %1607 = sst [smem:[#allocation21_spill]] %s1579_s2 }
   0x4   :  { %1608 = sst [smem:[#allocation22_spill]] %s1580_s3 }
   0x5   :  { %1609 = sst [smem:[#allocation23_spill]] %s1581_s4 }
   0x6   :  { %1610 = sst [smem:[#allocation24_spill]] %s1582_s5 }
   0x7   :  { %1611 = sst [smem:[#allocation25_spill]] %s1583_s6 }
   0x8   :  { %1612 = sst [smem:[#allocation26_spill]] %s1584_s7 }
   0x9   :  { %1613 = sst [smem:[#allocation27_spill]] %s1585_s8 }
   0xa   :  { %1614 = sst [smem:[#allocation28_spill]] %s1586_s9 }
   0xb   :  { %31 = vsyncpa [#allocation3], 0 }
   0xc   :  { %32 = vsyncpa [#allocation6], 0 }
   0xd   :  { %33 = vsyncpa [#allocation9], 0 }
   0xe   :  { %34 = vsyncpa [#allocation4], 0 }
   0xf   :  { %35 = vsyncpa [#allocation13], 0  ;;  %s1615_s6 = sld [smem:[#allocation27_spill]]  ;;  %s1259_s7 = smov [#allocation5]  }
  0x10   :  { %s69_s3 = sshll.u32 %s1259_s7, 4  ;;  %s105_s8 = sshll.u32 %s1593_s16, 4  ;;  %s70_s3 = int_to_ptr.vmem [resolvable:$true] %s69_s3  ;;  %s106_s8 = int_to_ptr.hbm [resolvable:$true] %s105_s8 }
  0x11   :  { %s1260_s27 = smov 128   ;;  %s1261_s4 = smov 8  }
  0x12   :  { %s1262_s28 = smov [#allocation8]   ;;  %s1616_s29 = sld [smem:[#allocation25_spill]] }
  0x13   :  { %s107_s9 = sshll.u32 %s1262_s28, 4  ;;  %s90_s7 = sshll.u32 %s1591_s14, 4  ;;  %s108_s9 = int_to_ptr.vmem [resolvable:$true] %s107_s9  ;;  %s91_s7 = int_to_ptr.hbm [resolvable:$true] %s90_s7 }
  0x14   :  { %113 = dma.hbm_to_vmem [thread:$0]  %s106_s8, 512, %s108_s9, [#allocation9], %s1260_s27, %s1260_s27, %s1261_s4  }
  0x15   :  { %s67_s30 = sshll.u32 %s1615_s6, 4  ;;  %s1263_s26 = smov [#allocation2]   ;;  %s68_s30 = int_to_ptr.hbm [resolvable:$true] %s67_s30 }
  0x16   :  { %75 = dma.hbm_to_vmem [thread:$0]  %s68_s30, 512, %s70_s3, [#allocation6], %s1260_s27, %s1260_s27, %s1261_s4  }
  0x17   :  { %s54_s1 = sshll.u32 %s1263_s26, 4  ;;  %s1264_s30 = smov [#allocation7]   ;;  %s55_s1 = int_to_ptr.vmem [resolvable:$true] %s54_s1 }
  0x18   :  { %s52_s2 = sshll.u32 %s1616_s29, 4  ;;  %s92_s3 = sshll.u32 %s1264_s30, 4  ;;  %s53_s2 = int_to_ptr.hbm [resolvable:$true] %s52_s2  ;;  %s93_s3 = int_to_ptr.vmem [resolvable:$true] %s92_s3 }
  0x19   :  { %60 = dma.hbm_to_vmem [thread:$0]  %s53_s2, 512, %s55_s1, [#allocation3], %s1260_s27, %s1260_s27, %s1261_s4  }
  0x1a   :  { %s120_s0 = sshll.u32 %s1595_s18, 4  ;;  %s1265_s14 = smov [#allocation10]   ;;  %s121_s0 = int_to_ptr.hbm [resolvable:$true] %s120_s0 }
  0x1b   :  { %98 = dma.hbm_to_vmem [thread:$0]  %s91_s7, 512, %s93_s3, [#allocation6], %s1260_s27, %s1260_s27, %s1261_s4  }
  0x1c   :  { %s122_s8 = sshll.u32 %s1265_s14, 4  ;;  %s123_s8 = int_to_ptr.vmem [resolvable:$true] %s122_s8 }
  0x1d   :  { %128 = dma.hbm_to_vmem [thread:$0]  %s121_s0, 512, %s123_s8, [#allocation9], %s1260_s27, %s1260_s27, %s1261_s4  }
  0x1e   :  { %1249 = dma.done.wait [#allocation3], 512  }
  0x1f   :  { %1250 = vsyncadd [#allocation3], 4294966784 }
  0x20   :  { %1251 = dma.done.wait [#allocation6], 1024  }
  0x21   :  { %1252 = vsyncadd [#allocation6], 4294966272 }
  0x22   :  { %1253 = dma.done.wait [#allocation9], 1024  }
  0x23   :  { %1254 = vsyncadd [#allocation9], 4294966272  ;;  %vm199_vm0 = vcmask 64512   ;;  %s1617_s29 = sld [smem:[#allocation23_spill]]  ;;  %vm229_vm1 = vcmask 294144   ;;  %vm231_vm2 = vcmask 290048  }
  0x24   :  { %s1618_s6 = sld [smem:[#allocation21_spill]]  ;;  %vm257_vm3 = vcmask 1043456   ;;  %s1266_s28 = smov 96   ;;  %vm252_vm4 = vcmask 31744   ;;  %vm304_vm5 = vcmask 1045504   ;;  %vm300_vm6 = vcmask 97280  }
  0x25   :  { %s1619_s3 = sld [smem:[#allocation22_spill]]  ;;  %vm428_vm12 = vcmask 259072   ;;  %s981_s1 = sshll.u32 %s1602_s25, 4  ;;  %s982_s1 = int_to_ptr.hbm [resolvable:$true] %s981_s1 }
  0x26   :  { %s1620_s14 = sld [smem:[#allocation20_spill]] }
  0x27   :  { %s1621_s9 = sld [smem:[#allocation24_spill]] }
  0x28   :  { %s1623_s30 = sld [smem:[#allocation28_spill]] }
  0x29   :  { %v160_v0 = vld [vmem:[%s1617_s29] sm:$0xff]  ;;  %s1624_s8 = sld [smem:[#allocation19_spill]] }
  0x2a   :  { %v196_v1 = vld [vmem:[%s1618_s6] sm:$0xff]  ;;  %221 = vmatpush.msra.mxu0 %v160_v0  ;;  %v197_v2 = vld [vmem:[%s1618_s6 + $0x8] sm:$0xf] }
  0x2b   :  { %998 = vmatmul.msk.f32.vlgmr.msra.gmra.mxu0 %vm199_vm0, %v196_v1  ;;  %v1442_v13 = vld [vmem:[%s1619_s3] sm:$0xf] }
  0x2c   :  { %1000 = vmatpush.msk.msra.mxu1 %vm257_vm3, %v1442_v13  ;;  %v198_v35 = vld [vmem:[%s1620_s14] sm:$0x7] }
  0x33   :  { %999 = vmatmul.msk.f32.gmra.mxu0 %vm199_vm0, %v197_v2 }
  0xa8   :  { %v223_v3 = vpop.f32.mrf.mxu0 }
  0xa9   :  { %v230_v5 = vsel %vm229_vm1, %v223_v3, -inf  ;;  %vm469_vm1 = vcmask 261120  }
  0xb0   :  { %v226_v4 = vpop.f32.mrf.mxu0 }
  0xb1   :  { %v232_v6 = vsel %vm231_vm2, %v226_v4, -inf }
  0xb2   :  { %v233_v7 = vmax.f32 %v230_v5, %v232_v6 }
  0xb4   :  { %v234_v8 = vrot.slane %v233_v7, 4 }
  0xb6   :  { %v235_v9 = vmax.f32 %v233_v7, %v234_v8 }
  0xb8   :  { %v236_v10 = vrot.slane %v235_v9, 2 }
  0xba   :  { %v237_v11 = vmax.f32 %v235_v9, %v236_v10 }
  0xbc   :  { %v238_v12 = vrot.slane %v237_v11, 1 }
  0xbe   :  { %v239_v14 = vmax.f32 %v237_v11, %v238_v12  ;;  %v1041_v11 = vld [vmem:[%s1621_s9] ss:$0 sm:$0xff] }
  0xc0   :  { %v240_v15 = vsub.f32 %v223_v3, %v239_v14  ;;  %v241_v16 = vsub.f32 %v226_v4, %v239_v14 }
  0xc2   :  { %v242_v17 = vmul.f32 1.442695, %v240_v15  ;;  %v244_v18 = vmul.f32 1.442695, %v241_v16 }
  0xc4   :  { %1055 = vpow2.f32 %v242_v17  ;;  %v1267_v17 = vmov 32.0  }
  0xc5   :  { %1057 = vpow2.f32 %v244_v18 }
  0xca   :  { %v1056_v19 = vpop.eup %1055 }
  0xcb   :  { %v1058_v20 = vpop.eup %1057  ;;  %248 = vrot.lane.b32.xlu0 %v1056_v19, %s1266_s28  ;;  %v293_v21 = vpack.c.bf16 %v1056_v19, %v1056_v19 }
  0xcc   :  { %v294_v22 = vpack.c.bf16 %v1058_v20, %v1058_v20 }
  0xcd   :  { %v295_v23 = vunpack.c.l.bf16 %v293_v21  ;;  %v363_v28 = vunpack.c.l.b16 %v293_v21 }
  0xce   :  { %v296_v24 = vunpack.c.l.bf16 %v294_v22  ;;  %v364_v29 = vunpack.c.l.b16 %v294_v22 }
  0xcf   :  { %v297_v25 = vsub.f32 %v1056_v19, %v295_v23 }
  0xd0   :  { %v298_v26 = vsub.f32 %v1058_v20, %v296_v24  ;;  %v365_v30 = vpack.c.b16 %v364_v29, %v363_v28  ;;  %v165_v29 = vld [vmem:[#allocation2 + $0x18] sm:$0xff] }
  0xd2   :  { %v299_v27 = vpack.c.bf16 %v298_v26, %v297_v25 }
  0xd3   :  { %250 = vrot.lane.b32.xlu0 %v1058_v20, %s1266_s28 }
  0xd4   :  { %343 = vrot.lane.b32.xlu1 %v299_v27, %s1266_s28 }
  0xdc   :  { %366 = vrot.lane.b32.xlu1 %v365_v30, %s1266_s28  ;;  %v164_v30 = vld [vmem:[#allocation2 + $0x10] sm:$0xff] }
 0x13d   :  { %v249_v31 = vpop.permute.xlu0 %248 }
 0x13e   :  { %1001 = vmatmul.msk.f32.vlgmr.msra.gmra.mxu1 %vm252_vm4, %v249_v31  ;;  %v163_v31 = vld [vmem:[#allocation2 + $0x8] sm:$0xff] }
 0x145   :  { %v251_v32 = vpop.permute.xlu0 %250 }
 0x146   :  { %v344_v33 = vpop.permute.xlu1 %343  ;;  %1002 = vmatmul.msk.f32.gmra.mxu1 %vm252_vm4, %v251_v32  ;;  %v162_v32 = vld [vmem:[#allocation2] sm:$0xff] }
 0x147   :  { %v346_v34 = vsel %vm304_vm5, %v344_v33, 0  ;;  %v170_v33 = vld [vmem:[#allocation5 + $0x18] sm:$0xff] }
 0x148   :  { %355 = vmatpush.bf16.msrb.mxu0 %v346_v34 }
 0x14b   :  { %1005 = vmatmul.msk.bf16.vlgmr.msrb.gmra.mxu0 %vm300_vm6, %v198_v35 }
 0x14c   :  { %1007 = vmatpush.msk.msra.mxu0 %vm257_vm3, %v1442_v13 }
 0x14e   :  { %1012 = vmatpush.msk.msrb.mxu0 %vm257_vm3, %v1442_v13  ;;  %v367_v36 = vpop.permute.xlu1 %366 }
 0x14f   :  { %v369_v37 = vsel %vm304_vm5, %v367_v36, 0 }
 0x150   :  { %378 = vmatpush.bf16.msrb.mxu1 %v369_v37 }
 0x153   :  { %1006 = vmatmul.msk.bf16.vlgmr.msrb.gmra.mxu1 %vm300_vm6, %v198_v35 }
 0x1bb   :  { %v278_v38 = vpop.f32.mrf.mxu1 }
 0x1bc   :  { %v284_v39 = vmul.f32 %v278_v38, %v223_v3 }
 0x1be   :  { %v286_v40 = vpack.c.bf16 %v284_v39, %v284_v39 }
 0x1c0   :  { %v288_v43 = vunpack.c.l.bf16 %v286_v40  ;;  %v323_v47 = vunpack.c.l.b16 %v286_v40 }
 0x1c2   :  { %v290_v49 = vsub.f32 %v284_v39, %v288_v43  ;;  %v1042_v43 = vld [vmem:[%s1587_s10] ss:$0 sm:$0xff]  ;;  %s1622_s10 = sld [smem:[#allocation26_spill]] }
 0x1c3   :  { %v281_v41 = vpop.f32.mrf.mxu1 }
 0x1c4   :  { %v285_v42 = vmul.f32 %v281_v41, %v226_v4 }
 0x1c6   :  { %v287_v44 = vpack.c.bf16 %v285_v42, %v285_v42 }
 0x1c8   :  { %v289_v45 = vunpack.c.l.bf16 %v287_v44  ;;  %v357_v46 = vpop.f32.mrf.mxu0  ;;  %v324_v48 = vunpack.c.l.b16 %v287_v44 }
 0x1ca   :  { %v291_v50 = vsub.f32 %v285_v42, %v289_v45  ;;  %v325_v51 = vpack.c.b16 %v324_v48, %v323_v47 }
 0x1cc   :  { %v327_v52 = vsel %vm304_vm5, %v325_v51, 0  ;;  %v292_v53 = vpack.c.bf16 %v291_v50, %v290_v49  ;;  %v169_v49 = vld [vmem:[#allocation5 + $0x10] sm:$0xff]  ;;  %v168_v50 = vld [vmem:[#allocation5 + $0x8] sm:$0xff]  ;;  %v167_v51 = vld [vmem:[#allocation5] sm:$0xff] }
 0x1cd   :  { %336 = vmatpush.bf16.msra.mxu3 %v327_v52  ;;  %v1044_v52 = vld [vmem:[%s1622_s10] ss:$0 sm:$0xff] }
 0x1ce   :  { %v306_v54 = vsel %vm304_vm5, %v292_v53, 0 }
 0x1cf   :  { %315 = vmatpush.bf16.msra.mxu2 %v306_v54 }
 0x1d0   :  { %v359_v55 = vpop.f32.mrf.mxu0  ;;  %v380_v56 = vpop.f32.mrf.mxu1  ;;  %1004 = vmatmul.msk.bf16.vlgmr.msra.gmra.mxu3 %vm300_vm6, %v198_v35 }
 0x1d1   :  { %v381_v57 = vadd.f32 %v380_v56, %v357_v46  ;;  %485 = vmatpush.msrb.mxu3 %v165_v29  ;;  %v1043_v46 = vld [vmem:[%s1588_s11] ss:$0 sm:$0xff] }
 0x1d2   :  { %1003 = vmatmul.msk.bf16.vlgmr.msra.gmra.mxu2 %vm300_vm6, %v198_v35  ;;  %v1045_v56 = vld [vmem:[%s1623_s30] ss:$0 sm:$0xff] }
 0x1d3   :  { %1008 = vmatmul.msk.f32.vlgmr.msra.gmra.mxu0 %vm252_vm4, %v381_v57  ;;  %486 = vmatpush.msrb.mxu3 %v164_v30 }
 0x1d4   :  { %512 = vmatpush.msrb.mxu2 %v170_v33 }
 0x1d5   :  { %487 = vmatpush.msrb.mxu3 %v163_v31 }
 0x1d6   :  { %513 = vmatpush.msrb.mxu2 %v169_v49 }
 0x1d7   :  { %488 = vmatpush.msrb.mxu3 %v162_v32 }
 0x1d8   :  { %v382_v58 = vpop.f32.mrf.mxu1  ;;  %514 = vmatpush.msrb.mxu2 %v168_v50 }
 0x1da   :  { %515 = vmatpush.msrb.mxu2 %v167_v51 }
 0x250   :  { %v404_v59 = vpop.f32.mrf.mxu0 }
 0x251   :  { %vm407_vm7 = vcmp.gt.f32.partialorder %v404_v59, 0.0 }
 0x252   :  { %v408_v60 = vsel %vm407_vm7, %v404_v59, 1.0  ;;  %vm579_vm7 = vcmask 292096  }
 0x253   :  { %1059 = vrcp.f32 %v408_v60  ;;  %v338_v61 = vpop.f32.mrf.mxu3  ;;  %v420_v3 = vand.u32 2147483648, %v408_v60  ;;  %v418_v6 = vand.u32 2147483647, %v408_v60  ;;  %vm414_vm9 = vweird.f32 %v408_v60 }
 0x254   :  { %1061 = vrcp.f32 %v1267_v17  ;;  %v1046_v17 = vld [vmem:[%s1589_s12] ss:$0 sm:$0xff] }
 0x255   :  { %v317_v62 = vpop.f32.mrf.mxu2  ;;  %v421_v9 = vor.u32 1.1754944e-38, %v420_v3  ;;  %vm419_vm11 = vcmp.eq.f32.partialorder %v418_v6, 8.507059e+37  ;;  %v179_v3 = vld [vmem:[#allocation7 + $0x18] sm:$0xff]  ;;  %v176_v6 = vld [vmem:[#allocation7] sm:$0xff] }
 0x256   :  { %v339_v7 = vadd.f32 %v338_v61, %v317_v62  ;;  %571 = vmatpush.msra.mxu3 %v179_v3 }
 0x259   :  { %v1060_v63 = vpop.eup %1059 }
 0x25a   :  { %v410_v0 = vmul.f32 %v1060_v63, %v408_v60  ;;  %vm415_vm8 = vweird.f32 %v1060_v63  ;;  %v1062_v18 = vpop.eup %1061 }
 0x25b   :  { %v340_v1 = vpop.f32.mrf.mxu3  ;;  %vm416_vm10 = vmor %vm414_vm9, %vm415_vm8  ;;  %v433_v19 = vmul.f32 32.0, %v1062_v18  ;;  %vm437_vm13 = vweird.f32 %v1062_v18  ;;  %vm633_vm8 = vcmask 1042432   ;;  %vm629_vm9 = vcmask 48128  }
 0x25c   :  { %v411_v2 = vsub.f32 1.0, %v410_v0 }
 0x25d   :  { %v319_v4 = vpop.f32.mrf.mxu2  ;;  %v434_v20 = vsub.f32 1.0, %v433_v19 }
 0x25e   :  { %v412_v5 = vmul.f32 %v1060_v63, %v411_v2  ;;  %v178_v4 = vld [vmem:[#allocation7 + $0x10] sm:$0xff] }
 0x25f   :  { %v435_v21 = vmul.f32 %v1062_v18, %v434_v20  ;;  %572 = vmatpush.msra.mxu3 %v178_v4  ;;  %v1047_v20 = vld [vmem:[%s1590_s13] ss:$0 sm:$0xff] }
 0x260   :  { %v413_v8 = vadd.f32 %v1060_v63, %v412_v5  ;;  %v177_v5 = vld [vmem:[#allocation7 + $0x8] sm:$0xff] }
 0x261   :  { %v436_v22 = vadd.f32 %v1062_v18, %v435_v21  ;;  %573 = vmatpush.msra.mxu3 %v177_v5 }
 0x262   :  { %v417_v10 = vsel %vm416_vm10, %v1060_v63, %v413_v8 }
 0x263   :  { %v422_v12 = vsel %vm419_vm11, %v421_v9, %v417_v10  ;;  %v1472_v23 = vsel %vm437_vm13, %v1062_v18, %v436_v22  ;;  %574 = vmatpush.msra.mxu3 %v176_v6 }
 0x264   :  { %v423_v14 = vmul.f32 %v422_v12, %v339_v7 }
 0x266   :  { %v427_v15 = vadd.f32 %v1041_v11, %v423_v14 }
 0x268   :  { %v429_v16 = vsel %vm428_vm12, %v427_v15, 0.0 }
 0x269   :  { %430 = vadd.xlane.f32.xlu2 %v429_v16 }
 0x2dc   :  { %v431_v24 = vpop.xlane.xlu2 %430 }
 0x2dd   :  { %v439_v25 = vmul.f32 %v1472_v23, %v431_v24 }
 0x2df   :  { %v440_v26 = vsub.f32 %v427_v15, %v439_v25 }
 0x2e1   :  { %v441_v27 = vmul.f32 %v440_v26, %v440_v26 }
 0x2e3   :  { %v442_v28 = vsel %vm428_vm12, %v441_v27, 0.0 }
 0x2e4   :  { %443 = vadd.xlane.f32.xlu2 %v442_v28 }
 0x357   :  { %v444_v34 = vpop.xlane.xlu2 %443 }
 0x358   :  { %v445_v35 = vmul.f32 %v444_v34, %v1472_v23 }
 0x35a   :  { %v446_v36 = vadd.f32 1e-05, %v445_v35 }
 0x35c   :  { %1063 = vrsqrt.f32 %v446_v36  ;;  %vm453_vm15 = vweird.f32 %v446_v36 }
 0x362   :  { %v1064_v37 = vpop.eup %1063 }
 0x363   :  { %v448_v38 = vmul.f32 %v1064_v37, %v446_v36  ;;  %vm454_vm14 = vweird.f32 %v1064_v37 }
 0x364   :  { %vm455_vm0 = vmor %vm453_vm15, %vm454_vm14 }
 0x365   :  { %v449_v39 = vmul.f32 %v1064_v37, %v448_v38 }
 0x367   :  { %v450_v40 = vmul.f32 0.5, %v449_v39 }
 0x369   :  { %v451_v41 = vsub.f32 1.5, %v450_v40 }
 0x36b   :  { %v452_v42 = vmul.f32 %v1064_v37, %v451_v41 }
 0x36d   :  { %v456_v44 = vsel %vm455_vm0, %v1064_v37, %v452_v42 }
 0x36e   :  { %v457_v45 = vmul.f32 %v456_v44, %v440_v26  ;;  %v1029_v44 = vld [vmem:[%s1624_s8] sm:$0x30] }
 0x370   :  { %v461_v47 = vmul.f32 %v1042_v43, %v457_v45  ;;  %v1016_v43 = vld [vmem:[%s1624_s8] sm:$0xf] }
 0x372   :  { %v465_v48 = vadd.f32 %v1043_v46, %v461_v47  ;;  %v1017_v47 = vor.u32 %v1029_v44, %v1016_v43 }
 0x374   :  { %1009 = vmatmul.msk.f32.vlgmr.msrb.gmra.mxu3 %vm469_vm1, %v465_v48 }
 0x3f7   :  { %v490_v53 = vpop.f32.mrf.mxu3 }
 0x3f8   :  { %v491_v54 = vadd.f32 %v1044_v52, %v490_v53 }
 0x3fa   :  { %v493_v55 = vmax.f32 %v491_v54, 0.0 }
 0x3fc   :  { %1010 = vmatmul.msk.f32.vlgmr.msrb.gmra.mxu2 %vm469_vm1, %v493_v55 }
 0x47f   :  { %v517_v57 = vpop.f32.mrf.mxu2 }
 0x480   :  { %v518_v58 = vadd.f32 %v1045_v56, %v517_v57 }
 0x482   :  { %v520_v59 = vmax.f32 %v518_v58, 0.0 }
 0x484   :  { %v521_v60 = vadd.f32 %v520_v59, %v465_v48 }
 0x486   :  { %v522_v61 = vsel %vm428_vm12, %v521_v60, 0.0 }
 0x487   :  { %523 = vadd.xlane.f32.xlu0 %v522_v61 }
 0x4fa   :  { %v524_v62 = vpop.xlane.xlu0 %523 }
 0x4fb   :  { %v525_v63 = vmul.f32 %v524_v62, %v1472_v23 }
 0x4fd   :  { %v526_v0 = vsub.f32 %v521_v60, %v525_v63 }
 0x4ff   :  { %v527_v1 = vmul.f32 %v526_v0, %v526_v0 }
 0x501   :  { %v528_v2 = vsel %vm428_vm12, %v527_v1, 0.0 }
 0x502   :  { %529 = vadd.xlane.f32.xlu1 %v528_v2 }
 0x575   :  { %v530_v7 = vpop.xlane.xlu1 %529 }
 0x576   :  { %v531_v8 = vmul.f32 %v530_v7, %v1472_v23 }
 0x578   :  { %v532_v9 = vadd.f32 1e-05, %v531_v8 }
 0x57a   :  { %1065 = vrsqrt.f32 %v532_v9  ;;  %vm539_vm5 = vweird.f32 %v532_v9 }
 0x580   :  { %v1066_v10 = vpop.eup %1065 }
 0x581   :  { %v534_v11 = vmul.f32 %v1066_v10, %v532_v9  ;;  %vm540_vm2 = vweird.f32 %v1066_v10 }
 0x582   :  { %vm541_vm6 = vmor %vm539_vm5, %vm540_vm2  ;;  %vm781_vm5 = vcmask 257024  }
 0x583   :  { %v535_v12 = vmul.f32 %v1066_v10, %v534_v11 }
 0x585   :  { %v536_v14 = vmul.f32 0.5, %v535_v12 }
 0x587   :  { %v537_v15 = vsub.f32 1.5, %v536_v14 }
 0x589   :  { %v538_v16 = vmul.f32 %v1066_v10, %v537_v15 }
 0x58b   :  { %v542_v18 = vsel %vm541_vm6, %v1066_v10, %v538_v16 }
 0x58c   :  { %v543_v19 = vmul.f32 %v542_v18, %v526_v0 }
 0x58e   :  { %v547_v21 = vmul.f32 %v1046_v17, %v543_v19  ;;  %v1048_v19 = vld [vmem:[%s1592_s15] ss:$0 sm:$0xff] }
 0x590   :  { %v551_v22 = vadd.f32 %v1047_v20, %v547_v21 }
 0x592   :  { %v552_v24 = vmax.f32 %v551_v22, 0.0 }
 0x594   :  { %1011 = vmatmul.msk.f32.vlgmr.msra.gmra.mxu3 %vm469_vm1, %v552_v24  ;;  %553 = vst.msk [vmem:[#allocation12] sm:$0x3f] %vm428_vm12, %v552_v24 }
 0x617   :  { %v576_v25 = vpop.f32.mrf.mxu3 }
 0x618   :  { %v580_v26 = vsel %vm579_vm7, %v576_v25, -inf }
 0x619   :  { %v581_v27 = vrot.slane %v580_v26, 4 }
 0x61b   :  { %v582_v28 = vmax.f32 %v580_v26, %v581_v27 }
 0x61d   :  { %v583_v29 = vrot.slane %v582_v28, 2 }
 0x61f   :  { %v584_v30 = vmax.f32 %v582_v28, %v583_v29 }
 0x621   :  { %v585_v31 = vrot.slane %v584_v30, 1 }
 0x623   :  { %v586_v32 = vmax.f32 %v584_v30, %v585_v31 }
 0x625   :  { %v587_v33 = vsub.f32 %v576_v25, %v586_v32 }
 0x627   :  { %v588_v34 = vmul.f32 1.442695, %v587_v33 }
 0x629   :  { %1067 = vpow2.f32 %v588_v34 }
 0x62f   :  { %v1068_v35 = vpop.eup %1067 }
 0x630   :  { %591 = vrot.lane.b32.xlu2 %v1068_v35, %s1266_s28  ;;  %v620_v36 = vpack.c.bf16 %v1068_v35, %v1068_v35 }
 0x632   :  { %v621_v37 = vunpack.c.l.bf16 %v620_v36  ;;  %v689_v40 = vunpack.c.l.b16 %v620_v36 }
 0x634   :  { %v622_v38 = vsub.f32 %v1068_v35, %v621_v37  ;;  %v690_v41 = vpack.c.b16 %v689_v40, %v689_v40 }
 0x636   :  { %v623_v39 = vpack.c.bf16 %v622_v38, %v622_v38 }
 0x638   :  { %669 = vrot.lane.b32.xlu2 %v623_v39, %s1266_s28 }
 0x640   :  { %691 = vrot.lane.b32.xlu2 %v690_v41, %s1266_s28 }
 0x68a   :  { %v592_v42 = vpop.permute.xlu2 %591 }
 0x68b   :  { %1013 = vmatmul.msk.f32.vlgmr.msrb.gmra.mxu0 %vm252_vm4, %v592_v42 }
 0x692   :  { %v670_v45 = vpop.permute.xlu2 %669 }
 0x693   :  { %v672_v46 = vsel %vm633_vm8, %v670_v45, 0 }
 0x694   :  { %681 = vmatpush.bf16.msrb.mxu3 %v672_v46 }
 0x697   :  { %1020 = vmatmul.msk.bf16.vlgmr.msrb.gmra.mxu3 %vm629_vm9, %v1017_v47 }
 0x69a   :  { %v692_v48 = vpop.permute.xlu2 %691 }
 0x69b   :  { %v694_v49 = vsel %vm633_vm8, %v692_v48, 0  ;;  %v184_v48 = vld [vmem:[#allocation8 + $0x18] sm:$0xff] }
 0x69c   :  { %703 = vmatpush.bf16.msra.mxu0 %v694_v49  ;;  %v183_v49 = vld [vmem:[#allocation8 + $0x10] sm:$0xff] }
 0x69f   :  { %1021 = vmatmul.msk.bf16.vlgmr.msra.gmra.mxu0 %vm629_vm9, %v1017_v47 }
 0x708   :  { %v612_v50 = vpop.f32.mrf.mxu0 }
 0x709   :  { %v615_v51 = vmul.f32 %v612_v50, %v576_v25  ;;  %v182_v50 = vld [vmem:[#allocation8 + $0x8] sm:$0xff] }
 0x70b   :  { %v616_v52 = vpack.c.bf16 %v615_v51, %v615_v51 }
 0x70d   :  { %v617_v53 = vunpack.c.l.bf16 %v616_v52  ;;  %v652_v54 = vsel %vm633_vm8, %v616_v52, 0 }
 0x70e   :  { %661 = vmatpush.bf16.msra.mxu2 %v652_v54 }
 0x70f   :  { %v618_v55 = vsub.f32 %v615_v51, %v617_v53  ;;  %v181_v51 = vld [vmem:[#allocation8] sm:$0xff] }
 0x711   :  { %v619_v56 = vpack.c.bf16 %v618_v55, %v618_v55  ;;  %1019 = vmatmul.msk.bf16.vlgmr.msra.gmra.mxu2 %vm629_vm9, %v1017_v47  ;;  %v189_v55 = vld [vmem:[#allocation10 + $0x18] sm:$0xff] }
 0x712   :  { %854 = vmatpush.msrb.mxu2 %v184_v48  ;;  %888 = vmatpush.msra.mxu3 %v189_v55 }
 0x713   :  { %v635_v57 = vsel %vm633_vm8, %v619_v56, 0 }
 0x714   :  { %644 = vmatpush.bf16.msra.mxu1 %v635_v57  ;;  %855 = vmatpush.msrb.mxu2 %v183_v49 }
 0x716   :  { %856 = vmatpush.msrb.mxu2 %v182_v50 }
 0x717   :  { %1018 = vmatmul.msk.bf16.vlgmr.msra.gmra.mxu1 %vm629_vm9, %v1017_v47 }
 0x718   :  { %1022 = vmatpush.msk.msrb.mxu1 %vm257_vm3, %v1442_v13  ;;  %857 = vmatpush.msrb.mxu2 %v181_v51 }
 0x71a   :  { %v683_v58 = vpop.f32.mrf.mxu3 }
 0x71c   :  { %v705_v59 = vpop.f32.mrf.mxu0 }
 0x71d   :  { %v706_v60 = vadd.f32 %v705_v59, %v683_v58 }
 0x722   :  { %v685_v61 = vpop.f32.mrf.mxu3 }
 0x724   :  { %v707_v62 = vpop.f32.mrf.mxu0 }
 0x725   :  { %v708_v63 = vadd.f32 %v707_v62, %v685_v61 }
 0x727   :  { %1023 = vmatmul.msk.f32.vlgmr.msrb.gmra.mxu1 %vm252_vm4, %v706_v60 }
 0x72f   :  { %1024 = vmatmul.msk.f32.gmra.mxu1 %vm252_vm4, %v708_v63 }
 0x794   :  { %v646_v0 = vpop.f32.mrf.mxu1  ;;  %v663_v8 = vpop.f32.mrf.mxu2 }
 0x795   :  { %v664_v16 = vadd.f32 %v663_v8, %v646_v0 }
 0x79c   :  { %v648_v1 = vpop.f32.mrf.mxu1  ;;  %v665_v28 = vpop.f32.mrf.mxu2 }
 0x79d   :  { %v666_v32 = vadd.f32 %v665_v28, %v648_v1  ;;  %v1052_v28 = vld [vmem:[%s1596_s19] ss:$0 sm:$0xff] }
 0x7a4   :  { %v733_v2 = vpop.f32.mrf.mxu1 }
 0x7a5   :  { %vm739_vm10 = vcmp.gt.f32.partialorder %v733_v2, 0.0 }
 0x7a6   :  { %v741_v3 = vsel %vm739_vm10, %v733_v2, 1.0 }
 0x7a7   :  { %1069 = vrcp.f32 %v741_v3  ;;  %v754_v9 = vand.u32 2147483648, %v741_v3  ;;  %v752_v11 = vand.u32 2147483647, %v741_v3  ;;  %vm748_vm12 = vweird.f32 %v741_v3 }
 0x7a9   :  { %v755_v15 = vor.u32 1.1754944e-38, %v754_v9  ;;  %vm753_vm13 = vcmp.eq.f32.partialorder %v752_v11, 8.507059e+37 }
 0x7ac   :  { %v736_v4 = vpop.f32.mrf.mxu1 }
 0x7ad   :  { %v1070_v13 = vpop.eup %1069  ;;  %vm740_vm3 = vcmp.gt.f32.partialorder %v736_v4, 0.0 }
 0x7ae   :  { %v744_v5 = vmul.f32 %v1070_v13, %v741_v3  ;;  %v742_v6 = vsel %vm740_vm3, %v736_v4, 1.0  ;;  %vm749_vm11 = vweird.f32 %v1070_v13  ;;  %v1049_v3 = vld [vmem:[%s1597_s20] ss:$0 sm:$0xff] }
 0x7af   :  { %1071 = vrcp.f32 %v742_v6  ;;  %vm750_vm4 = vmor %vm748_vm12, %vm749_vm11  ;;  %v769_v24 = vand.u32 2147483648, %v742_v6  ;;  %v767_v26 = vand.u32 2147483647, %v742_v6  ;;  %vm763_vm15 = vweird.f32 %v742_v6 }
 0x7b0   :  { %v745_v7 = vsub.f32 1.0, %v744_v5 }
 0x7b1   :  { %v770_v31 = vor.u32 1.1754944e-38, %v769_v24  ;;  %vm768_vm2 = vcmp.eq.f32.partialorder %v767_v26, 8.507059e+37 }
 0x7b2   :  { %v746_v10 = vmul.f32 %v1070_v13, %v745_v7 }
 0x7b4   :  { %v747_v12 = vadd.f32 %v1070_v13, %v746_v10 }
 0x7b5   :  { %v1072_v14 = vpop.eup %1071 }
 0x7b6   :  { %v759_v17 = vmul.f32 %v1072_v14, %v742_v6  ;;  %v751_v18 = vsel %vm750_vm4, %v1070_v13, %v747_v12  ;;  %vm764_vm14 = vweird.f32 %v1072_v14  ;;  %v1050_v6 = vld [vmem:[%s1598_s21] ss:$0 sm:$0xff] }
 0x7b7   :  { %v756_v20 = vsel %vm753_vm13, %v755_v15, %v751_v18  ;;  %vm765_vm0 = vmor %vm763_vm15, %vm764_vm14  ;;  %v187_v18 = vld [vmem:[#allocation10 + $0x8] sm:$0xff] }
 0x7b8   :  { %v760_v21 = vsub.f32 1.0, %v759_v17  ;;  %v757_v22 = vmul.f32 %v756_v20, %v664_v16  ;;  %v188_v17 = vld [vmem:[#allocation10 + $0x10] sm:$0xff]  ;;  %v1051_v20 = vld [vmem:[%s1594_s17] ss:$0 sm:$0xff]  ;;  %s1268_s17 = smov [#allocation12]  }
 0x7b9   :  { %889 = vmatpush.msra.mxu3 %v188_v17  ;;  %s979_s19 = sshll.u32 %s1268_s17, 4  ;;  %s980_s19 = int_to_ptr.vmem [resolvable:$true] %s979_s19 }
 0x7ba   :  { %v761_v25 = vmul.f32 %v1072_v14, %v760_v21  ;;  %v776_v27 = vadd.f32 %v1048_v19, %v757_v22  ;;  %984 = dma.vmem_to_hbm [thread:$0]  %s980_s19, 128, %s982_s1, [#allocation13]  }
 0x7bb   :  { %890 = vmatpush.msra.mxu3 %v187_v18 }
 0x7bc   :  { %v762_v29 = vadd.f32 %v1072_v14, %v761_v25  ;;  %v778_v30 = vsel %vm469_vm1, %v776_v27, 0.0 }
 0x7bd   :  { %779 = vadd.xlane.f32.xlu2 %v778_v30 }
 0x7be   :  { %v766_v33 = vsel %vm765_vm0, %v1072_v14, %v762_v29 }
 0x7bf   :  { %v771_v34 = vsel %vm768_vm2, %v770_v31, %v766_v33 }
 0x7c0   :  { %v772_v35 = vmul.f32 %v771_v34, %v666_v32 }
 0x7c2   :  { %v777_v36 = vadd.f32 %v1048_v19, %v772_v35  ;;  %v186_v19 = vld [vmem:[#allocation10] sm:$0xff] }
 0x7c3   :  { %891 = vmatpush.msra.mxu3 %v186_v19 }
 0x7c4   :  { %v782_v37 = vsel %vm781_vm5, %v777_v36, 0.0 }
 0x7c5   :  { %783 = vadd.xlane.f32.xlu0 %v782_v37 }
 0x830   :  { %v780_v38 = vpop.xlane.xlu2 %779 }
 0x831   :  { %v785_v39 = vmul.f32 %v780_v38, %v1472_v23 }
 0x833   :  { %v787_v40 = vsub.f32 %v776_v27, %v785_v39 }
 0x835   :  { %v789_v41 = vmul.f32 %v787_v40, %v787_v40 }
 0x837   :  { %v791_v42 = vsel %vm469_vm1, %v789_v41, 0.0 }
 0x838   :  { %792 = vadd.xlane.f32.xlu1 %v791_v42  ;;  %v784_v43 = vpop.xlane.xlu0 %783 }
 0x839   :  { %v786_v44 = vmul.f32 %v784_v43, %v1472_v23 }
 0x83b   :  { %v788_v45 = vsub.f32 %v777_v36, %v786_v44 }
 0x83d   :  { %v790_v46 = vmul.f32 %v788_v45, %v788_v45 }
 0x83f   :  { %v794_v47 = vsel %vm781_vm5, %v790_v46, 0.0 }
 0x840   :  { %795 = vadd.xlane.f32.xlu0 %v794_v47 }
 0x8ab   :  { %v793_v52 = vpop.xlane.xlu1 %792 }
 0x8ac   :  { %v797_v53 = vmul.f32 %v793_v52, %v1472_v23 }
 0x8ae   :  { %v799_v54 = vadd.f32 1e-05, %v797_v53 }
 0x8b0   :  { %1073 = vrsqrt.f32 %v799_v54  ;;  %vm807_vm7 = vweird.f32 %v799_v54 }
 0x8b3   :  { %v796_v56 = vpop.xlane.xlu0 %795 }
 0x8b4   :  { %v798_v57 = vmul.f32 %v796_v56, %v1472_v23 }
 0x8b6   :  { %v1074_v58 = vpop.eup %1073  ;;  %v800_v59 = vadd.f32 1e-05, %v798_v57 }
 0x8b7   :  { %v802_v60 = vmul.f32 %v1074_v58, %v799_v54  ;;  %vm808_vm6 = vweird.f32 %v1074_v58 }
 0x8b8   :  { %1075 = vrsqrt.f32 %v800_v59  ;;  %vm809_vm8 = vmor %vm807_vm7, %vm808_vm6  ;;  %vm817_vm10 = vweird.f32 %v800_v59 }
 0x8b9   :  { %v803_v61 = vmul.f32 %v1074_v58, %v802_v60 }
 0x8bb   :  { %v804_v62 = vmul.f32 0.5, %v803_v61 }
 0x8bd   :  { %v805_v63 = vsub.f32 1.5, %v804_v62 }
 0x8be   :  { %v1076_v0 = vpop.eup %1075 }
 0x8bf   :  { %v806_v1 = vmul.f32 %v1074_v58, %v805_v63  ;;  %v812_v2 = vmul.f32 %v1076_v0, %v800_v59  ;;  %vm818_vm9 = vweird.f32 %v1076_v0  ;;  %v1053_v63 = vld [vmem:[%s1599_s22] ss:$0 sm:$0xff]  ;;  %s1269_s22 = smov [#allocation11]  }
 0x8c0   :  { %vm819_vm3 = vmor %vm817_vm10, %vm818_vm9  ;;  %s965_s0 = sshll.u32 %s1269_s22, 4  ;;  %s966_s0 = int_to_ptr.vmem [resolvable:$true] %s965_s0 }
 0x8c1   :  { %v810_v4 = vsel %vm809_vm8, %v1074_v58, %v806_v1  ;;  %v813_v13 = vmul.f32 %v1076_v0, %v812_v2  ;;  %v1054_v2 = vld [vmem:[%s1600_s23] ss:$0 sm:$0xff]  ;;  %s967_s23 = sshll.u32 %s1601_s24, 4  ;;  %s968_s23 = int_to_ptr.hbm [resolvable:$true] %s967_s23 }
 0x8c2   :  { %v821_v5 = vmul.f32 %v810_v4, %v787_v40 }
 0x8c3   :  { %v814_v7 = vmul.f32 0.5, %v813_v13 }
 0x8c4   :  { %v826_v8 = vmul.f32 %v1049_v3, %v821_v5 }
 0x8c5   :  { %v815_v9 = vsub.f32 1.5, %v814_v7 }
 0x8c6   :  { %v831_v10 = vadd.f32 %v1050_v6, %v826_v8 }
 0x8c7   :  { %v816_v11 = vmul.f32 %v1076_v0, %v815_v9 }
 0x8c8   :  { %1025 = vmatmul.msk.f32.vlgmr.msrb.gmra.mxu2 %vm469_vm1, %v831_v10 }
 0x8c9   :  { %v820_v12 = vsel %vm819_vm3, %v1076_v0, %v816_v11 }
 0x8ca   :  { %v822_v14 = vmul.f32 %v820_v12, %v788_v45 }
 0x8cc   :  { %v827_v15 = vmul.f32 %v1049_v3, %v822_v14 }
 0x8ce   :  { %v832_v16 = vadd.f32 %v1050_v6, %v827_v15 }
 0x8d0   :  { %1026 = vmatmul.msk.f32.gmra.mxu2 %vm469_vm1, %v832_v16 }
 0x94b   :  { %v859_v21 = vpop.f32.mrf.mxu2 }
 0x94c   :  { %v860_v22 = vadd.f32 %v1051_v20, %v859_v21 }
 0x94e   :  { %v865_v24 = vmax.f32 %v860_v22, 0.0 }
 0x950   :  { %1027 = vmatmul.msk.f32.vlgmr.msra.gmra.mxu3 %vm469_vm1, %v865_v24 }
 0x953   :  { %v862_v25 = vpop.f32.mrf.mxu2 }
 0x954   :  { %v863_v26 = vadd.f32 %v1051_v20, %v862_v25 }
 0x956   :  { %v866_v27 = vmax.f32 %v863_v26, 0.0 }
 0x958   :  { %1028 = vmatmul.msk.f32.gmra.mxu3 %vm469_vm1, %v866_v27 }
 0x9d3   :  { %v893_v29 = vpop.f32.mrf.mxu3 }
 0x9d4   :  { %v894_v30 = vadd.f32 %v1052_v28, %v893_v29 }
 0x9d6   :  { %v899_v31 = vmax.f32 %v894_v30, 0.0 }
 0x9d8   :  { %v901_v32 = vadd.f32 %v899_v31, %v831_v10 }
 0x9da   :  { %v903_v33 = vsel %vm469_vm1, %v901_v32, 0.0 }
 0x9db   :  { %904 = vadd.xlane.f32.xlu1 %v903_v33  ;;  %v896_v34 = vpop.f32.mrf.mxu3 }
 0x9dc   :  { %v897_v35 = vadd.f32 %v1052_v28, %v896_v34 }
 0x9de   :  { %v900_v36 = vmax.f32 %v897_v35, 0.0 }
 0x9e0   :  { %v902_v37 = vadd.f32 %v900_v36, %v832_v16 }
 0x9e2   :  { %v906_v38 = vsel %vm781_vm5, %v902_v37, 0.0 }
 0x9e3   :  { %907 = vadd.xlane.f32.xlu0 %v906_v38 }
 0xa4e   :  { %v905_v39 = vpop.xlane.xlu1 %904 }
 0xa4f   :  { %v909_v40 = vmul.f32 %v905_v39, %v1472_v23 }
 0xa51   :  { %v911_v41 = vsub.f32 %v901_v32, %v909_v40 }
 0xa53   :  { %v913_v42 = vmul.f32 %v911_v41, %v911_v41 }
 0xa55   :  { %v915_v43 = vsel %vm469_vm1, %v913_v42, 0.0 }
 0xa56   :  { %916 = vadd.xlane.f32.xlu1 %v915_v43  ;;  %v908_v44 = vpop.xlane.xlu0 %907 }
 0xa57   :  { %v910_v45 = vmul.f32 %v908_v44, %v1472_v23 }
 0xa59   :  { %v912_v46 = vsub.f32 %v902_v37, %v910_v45 }
 0xa5b   :  { %v914_v47 = vmul.f32 %v912_v46, %v912_v46 }
 0xa5d   :  { %v918_v48 = vsel %vm781_vm5, %v914_v47, 0.0 }
 0xa5e   :  { %919 = vadd.xlane.f32.xlu0 %v918_v48 }
 0xac9   :  { %v917_v49 = vpop.xlane.xlu1 %916 }
 0xaca   :  { %v921_v50 = vmul.f32 %v917_v49, %v1472_v23 }
 0xacc   :  { %v923_v51 = vadd.f32 1e-05, %v921_v50 }
 0xace   :  { %1077 = vrsqrt.f32 %v923_v51  ;;  %vm931_vm12 = vweird.f32 %v923_v51 }
 0xad1   :  { %v920_v52 = vpop.xlane.xlu0 %919 }
 0xad2   :  { %v922_v53 = vmul.f32 %v920_v52, %v1472_v23 }
 0xad4   :  { %v1078_v54 = vpop.eup %1077  ;;  %v924_v55 = vadd.f32 1e-05, %v922_v53 }
 0xad5   :  { %v926_v56 = vmul.f32 %v1078_v54, %v923_v51  ;;  %vm932_vm11 = vweird.f32 %v1078_v54 }
 0xad6   :  { %1079 = vrsqrt.f32 %v924_v55  ;;  %vm933_vm4 = vmor %vm931_vm12, %vm932_vm11  ;;  %vm941_vm14 = vweird.f32 %v924_v55 }
 0xad7   :  { %v927_v57 = vmul.f32 %v1078_v54, %v926_v56 }
 0xad9   :  { %v928_v58 = vmul.f32 0.5, %v927_v57 }
 0xadb   :  { %v929_v59 = vsub.f32 1.5, %v928_v58 }
 0xadc   :  { %v1080_v60 = vpop.eup %1079 }
 0xadd   :  { %v930_v61 = vmul.f32 %v1078_v54, %v929_v59  ;;  %v936_v62 = vmul.f32 %v1080_v60, %v924_v55  ;;  %vm942_vm13 = vweird.f32 %v1080_v60 }
 0xade   :  { %vm943_vm15 = vmor %vm941_vm14, %vm942_vm13 }
 0xadf   :  { %v934_v0 = vsel %vm933_vm4, %v1078_v54, %v930_v61  ;;  %v937_v1 = vmul.f32 %v1080_v60, %v936_v62 }
 0xae0   :  { %v945_v23 = vmul.f32 %v934_v0, %v911_v41 }
 0xae1   :  { %v938_v3 = vmul.f32 0.5, %v937_v1 }
 0xae2   :  { %v950_v4 = vmul.f32 %v1053_v63, %v945_v23 }
 0xae3   :  { %v939_v13 = vsub.f32 1.5, %v938_v3 }
 0xae4   :  { %v955_v5 = vadd.f32 %v1054_v2, %v950_v4 }
 0xae5   :  { %v940_v6 = vmul.f32 %v1080_v60, %v939_v13 }
 0xae6   :  { %v957_v7 = vmax.f32 %v955_v5, 0.0 }
 0xae7   :  { %v944_v8 = vsel %vm943_vm15, %v1080_v60, %v940_v6 }
 0xae8   :  { %v946_v9 = vmul.f32 %v944_v8, %v912_v46  ;;  %959 = vst.msk [vmem:[#allocation11] sm:$0xff] %vm469_vm1, %v957_v7 }
 0xaea   :  { %v951_v10 = vmul.f32 %v1053_v63, %v946_v9 }
 0xaec   :  { %v956_v11 = vadd.f32 %v1054_v2, %v951_v10 }
 0xaee   :  { %v958_v12 = vmax.f32 %v956_v11, 0.0 }
 0xaf0   :  { %960 = vst.msk [vmem:[#allocation11 + $0x8] sm:$0xf] %vm781_vm5, %v958_v12 }
 0xaf1   :  { %973 = dma.vmem_to_hbm [thread:$0]  %s966_s0, 256, %s968_s23, [#allocation4], %s1260_s27, %s1260_s27, %s1261_s4  }
 0xaf2   :  { %1255 = dma.done.wait [#allocation4], 256  }
 0xaf3   :  { %1256 = vsyncadd [#allocation4], 4294967040 }
 0xaf4   :  { %1257 = dma.done.wait [#allocation13], 128  }
 0xaf5   :  { %1258 = vsyncadd [#allocation13], 4294967168 }
 0xaf6   :  { %993 = vsyncpa [#allocation3], 1 }
 0xaf7   :  { %994 = vsyncpa [#allocation6], 1 }
 0xaf8   :  { %995 = vsyncpa [#allocation9], 1 }
 0xaf9   :  { %996 = vsyncpa [#allocation4], 1 }
 0xafa   :  { %997 = vsyncpa [#allocation13], 1 }

</bundles_post_ra>
